<compile_context>
chip_gen: v7x
topology: tpu7x:2x2x1
jax: 0.10.0
libtpu: 0.0.40
codegen_flags: <defaults>
</compile_context>

<pallas_src>
import jax
import jax.numpy as jnp
from jax import lax
from jax.experimental import pallas as pl
from jax.experimental.pallas import tpu as pltpu


# ---------------------------------------------------------------------------
# Kernel 1: LayerNorm -> ReLU -> input projection for both directions.
#   x_ref    : (rt, D)    row tile of time-major rows (row = t*B + b)
#   g_ref    : (1, D)     LayerNorm gamma
#   b_ref    : (1, D)     LayerNorm beta
#   w_ref    : (D, 6H)    [W_ih_f^T | W_ih_b^T]   (constant index -> resident)
#   bias_ref : (1, 6H)    b_ih with b_hh[r,z] folded in (n slot: b_ih only)
#   o_ref    : (rt, 6H)   fwd gates in lanes [:3H], bwd gates in lanes [3H:]
# ---------------------------------------------------------------------------
def ln_relu_proj_kernel(x_ref, g_ref, b_ref, w_ref, bias_ref, o_ref):
    x = x_ref[...]
    mean = jnp.mean(x, axis=-1, keepdims=True)
    var = jnp.mean(jnp.square(x - mean), axis=-1, keepdims=True)
    xn = (x - mean) * lax.rsqrt(var + 1e-5)
    xr = jnp.maximum(xn * g_ref[...] + b_ref[...], 0.0)           # LN + ReLU
    o_ref[...] = (
        jnp.dot(xr, w_ref[...], preferred_element_type=jnp.float32) + bias_ref[...]
    )


def ln_relu_proj(x_rows, ln_g, ln_b, w_cat, bias_cat, row_tile):
    rows, d_in = x_rows.shape
    h6 = w_cat.shape[1]
    nrt = rows // row_tile
    # TODO(synk): for very large D*6H on v7x, set vmem_limit_bytes explicitly
    # and shrink row_tile so 2*(rt*D + rt*6H)*4 + 2*D*6H*4 stays < ~48 MiB.
    return pl.pallas_call(
        ln_relu_proj_kernel,
        out_shape=jax.ShapeDtypeStruct((rows, h6), jnp.float32),
        grid_spec=pltpu.PrefetchScalarGridSpec(
            num_scalar_prefetch=0,
            grid=(nrt,),
            in_specs=[
                pl.BlockSpec((row_tile, d_in), lambda i: (i, 0)),
                pl.BlockSpec((1, d_in), lambda i: (0, 0)),
                pl.BlockSpec((1, d_in), lambda i: (0, 0)),
                pl.BlockSpec((d_in, h6), lambda i: (0, 0)),
                pl.BlockSpec((1, h6), lambda i: (0, 0)),
            ],
            out_specs=pl.BlockSpec((row_tile, h6), lambda i: (i, 0)),
        ),
        compiler_params=pltpu.CompilerParams(
            dimension_semantics=("parallel",),
        ),
    )(x_rows, ln_g.reshape(1, d_in), ln_b.reshape(1, d_in), w_cat, bias_cat)


# ---------------------------------------------------------------------------
# Kernel 2: fused bidirectional GRU recurrence, chunked over time.
#   gxf_ref : (TC, B, 6H)  gate chunk c            (fwd gates in lanes [:3H])
#   gxb_ref : (TC, B, 6H)  gate chunk nchunks-1-c  (bwd gates in lanes [3H:])
#   whh_ref : (H, 6H)      [W_hh_f^T | W_hh_b^T]
#   bhn_ref : (2B, H)      n-gate hidden bias per direction-row (stays inside, * r)
#   yf_ref  : (TC, B, H)   forward hidden states, chunk c
#   yb_ref  : (TC, B, H)   backward hidden states, chunk nchunks-1-c
#   h_ref   : (2B, H)      VMEM scratch carrying [h_fwd ; h_bwd] across chunks
# PyTorch gate order [r, z, n]; h' = (1 - z) * n + z * h.
# ---------------------------------------------------------------------------
def gru_bidir_kernel(gxf_ref, gxb_ref, whh_ref, bhn_ref, yf_ref, yb_ref, h_ref):
    c = pl.program_id(0)

    @pl.when(c == 0)
    def _():
        h_ref[...] = jnp.zeros_like(h_ref)       # h0 = 0 for both directions

    tc, b, h6 = gxf_ref.shape
    hd = h6 // 6
    h3 = 3 * hd
    whh = whh_ref[...]                           # hoisted out of the time loop
    bhn = bhn_ref[...]

    def step(s, h):
        # forward consumes local time s (global c*TC+s); backward consumes local
        # time TC-1-s of the mirrored chunk -> global time T-1-(c*TC+s).
        g_f = gxf_ref[s]                         # (B, 6H)
        g_b = gxb_ref[tc - 1 - s]                # (B, 6H)
        g = jnp.concatenate([g_f[:, :h3], g_b[:, h3:]], axis=0)          # (2B, 3H)
        ghw = jnp.dot(h, whh, preferred_element_type=jnp.float32)        # (2B, 6H)
        gh = jnp.concatenate([ghw[:b, :h3], ghw[b:, h3:]], axis=0)       # (2B, 3H)
        rz = jax.nn.sigmoid(g[:, :2 * hd] + gh[:, :2 * hd])              # fused r|z
        r = rz[:, :hd]
        z = rz[:, hd:]
        n = jnp.tanh(g[:, 2 * hd:] + r * (gh[:, 2 * hd:] + bhn))
        h_new = (1.0 - z) * n + z * h
        yf_ref[s] = h_new[:b]
        yb_ref[tc - 1 - s] = h_new[b:]
        return h_new

    h_ref[...] = lax.fori_loop(0, tc, step, h_ref[...], unroll=min(tc, 8))


def gru_bidir(gx, whh_cat, bhn_rows, t_chunk):
    t_len, b, h6 = gx.shape
    h = h6 // 6
    nchunks = t_len // t_chunk
    return pl.pallas_call(
        gru_bidir_kernel,
        out_shape=(jax.ShapeDtypeStruct((t_len, b, h), jnp.float32),
                   jax.ShapeDtypeStruct((t_len, b, h), jnp.float32)),
        grid_spec=pltpu.PrefetchScalarGridSpec(
            num_scalar_prefetch=0,
            grid=(nchunks,),
            in_specs=[
                pl.BlockSpec((t_chunk, b, h6), lambda c: (c, 0, 0)),
                pl.BlockSpec((t_chunk, b, h6), lambda c: (nchunks - 1 - c, 0, 0)),
                pl.BlockSpec((h, h6), lambda c: (0, 0)),
                pl.BlockSpec((2 * b, h), lambda c: (0, 0)),
            ],
            out_specs=[
                pl.BlockSpec((t_chunk, b, h), lambda c: (c, 0, 0)),
                pl.BlockSpec((t_chunk, b, h), lambda c: (nchunks - 1 - c, 0, 0)),
            ],
            scratch_shapes=[pltpu.VMEM((2 * b, h), jnp.float32)],
        ),
        compiler_params=pltpu.CompilerParams(
            # h is carried across chunks in the VMEM scratch -> sequential axis.
            dimension_semantics=("arbitrary",),
        ),
    )(gx, gx, whh_cat, bhn_rows)


# ---------------------------------------------------------------------------
# Tile / chunk selection (static shapes only).
# ---------------------------------------------------------------------------
def _pick_row_tile(rows):
    # Largest multiple-of-8 tile <= 1024 that divides rows (amortizes the
    # ~0.35us/step grid overhead without blowing VMEM); small inputs use one tile.
    if rows <= 1024:
        return rows
    for cand in range(1024, 7, -8):
        if rows % cand == 0:
            return cand
    # TODO(synk): pl.cdiv grid + masked tail for pathological row counts.
    return rows


def _pick_t_chunk(t_len, b, h):
    # Bound per-chunk gate bytes to ~2 MiB so kernel 2 never holds the whole
    # sequence in VMEM (v7x 64 MiB / 32 MiB scoped default).
    bytes_per_t = b * 6 * h * 4
    budget = 2 * 1024 * 1024
    if t_len * bytes_per_t <= budget:
        return t_len
    best = 1
    for cand in range(1, t_len + 1):
        if t_len % cand == 0 and cand * bytes_per_t <= budget:
            best = cand
    return best


# ---------------------------------------------------------------------------
# Full forward pass (parameter packing + tiny glue in plain JAX).
# ---------------------------------------------------------------------------
def rnn_forward(x, p):
    B, T, D = x.shape
    H = p["w_hh_f"].shape[1]

    # Fold the r/z hidden biases into the precomputed input-gate bias; the
    # n-gate hidden bias stays inside the recurrence (scaled by r).
    def fold_bias(b_ih, b_hh):
        return b_ih + jnp.concatenate([b_hh[: 2 * H], jnp.zeros((H,), jnp.float32)])

    w_ih_cat = jnp.concatenate([p["w_ih_f"].T, p["w_ih_b"].T], axis=1)        # (D, 6H)
    bias_cat = jnp.concatenate(
        [fold_bias(p["b_ih_f"], p["b_hh_f"]), fold_bias(p["b_ih_b"], p["b_hh_b"])]
    ).reshape(1, 6 * H)                                                        # (1, 6H)
    whh_cat = jnp.concatenate([p["w_hh_f"].T, p["w_hh_b"].T], axis=1)          # (H, 6H)
    bhn_rows = jnp.concatenate(
        [jnp.broadcast_to(p["b_hh_f"][2 * H:], (B, H)),
         jnp.broadcast_to(p["b_hh_b"][2 * H:], (B, H))], axis=0)               # (2B, H)

    # Time-major rows (row = t*B + b): the recurrence indexes gates along the
    # leading, untiled axis (cheap dynamic offset, no flips needed).
    x_rows = jnp.transpose(x, (1, 0, 2)).reshape(T * B, D)

    rows = T * B
    row_tile = _pick_row_tile(rows)
    gx = ln_relu_proj(x_rows, p["ln_g"], p["ln_b"], w_ih_cat, bias_cat, row_tile)
    gx = gx.reshape(T, B, 6 * H)

    t_chunk = _pick_t_chunk(T, B, H)
    y_f, y_b = gru_bidir(gx, whh_cat, bhn_rows, t_chunk)       # each (T, B, H)

    # Lane concat + (T,B)<->(B,T) swap; no direction-axis transpose needed.
    y = jnp.concatenate([y_f, y_b], axis=-1)                   # (T, B, 2H)
    y = jnp.transpose(y, (1, 0, 2))                            # (B, T, 2H)
    # Dropout(0.2): identity in eval mode.
    return y


# ---------------------------------------------------------------------------
# Pure-JAX reference for verification.
# ---------------------------------------------------------------------------
def gru_ref_dir(x, w_ih, w_hh, b_ih, b_hh, reverse):
    B, T, _ = x.shape
    H = w_hh.shape[1]
    h = jnp.zeros((B, H), jnp.float32)
    out = [None] * T
    ts = range(T - 1, -1, -1) if reverse else range(T)
    for t in ts:
        gi = x[:, t] @ w_ih.T + b_ih
        gh = h @ w_hh.T + b_hh
        r = jax.nn.sigmoid(gi[:, :H] + gh[:, :H])
        z = jax.nn.sigmoid(gi[:, H:2 * H] + gh[:, H:2 * H])
        n = jnp.tanh(gi[:, 2 * H:] + r * gh[:, 2 * H:])
        h = (1.0 - z) * n + z * h
        out[t] = h
    return jnp.stack(out, axis=1)


def rnn_ref(x, p):
    mean = jnp.mean(x, axis=-1, keepdims=True)
    var = jnp.mean((x - mean) ** 2, axis=-1, keepdims=True)
    xn = (x - mean) * lax.rsqrt(var + 1e-5) * p["ln_g"] + p["ln_b"]
    xn = jnp.maximum(xn, 0.0)
    y_f = gru_ref_dir(xn, p["w_ih_f"], p["w_hh_f"], p["b_ih_f"], p["b_hh_f"], False)
    y_b = gru_ref_dir(xn, p["w_ih_b"], p["w_hh_b"], p["b_ih_b"], p["b_hh_b"], True)
    return jnp.concatenate([y_f, y_b], axis=-1)


# ---------------------------------------------------------------------------
if __name__ == "__main__":
    B, T, D, H = 2, 8, 32, 32   # batch, seq, rnn_dim, hidden_size

    key = jax.random.PRNGKey(0)
    keys = jax.random.split(key, 12)
    s = 1.0 / jnp.sqrt(H)       # PyTorch GRU init range

    params = {
        "ln_g": jax.random.uniform(keys[0], (D,), jnp.float32, 0.5, 1.5),
        "ln_b": jax.random.uniform(keys[1], (D,), jnp.float32, -0.1, 0.1),
        "w_ih_f": jax.random.uniform(keys[2], (3 * H, D), jnp.float32, -s, s),
        "w_hh_f": jax.random.uniform(keys[3], (3 * H, H), jnp.float32, -s, s),
        "b_ih_f": jax.random.uniform(keys[4], (3 * H,), jnp.float32, -s, s),
        "b_hh_f": jax.random.uniform(keys[5], (3 * H,), jnp.float32, -s, s),
        "w_ih_b": jax.random.uniform(keys[6], (3 * H, D), jnp.float32, -s, s),
        "w_hh_b": jax.random.uniform(keys[7], (3 * H, H), jnp.float32, -s, s),
        "b_ih_b": jax.random.uniform(keys[8], (3 * H,), jnp.float32, -s, s),
        "b_hh_b": jax.random.uniform(keys[9], (3 * H,), jnp.float32, -s, s),
    }
    x = jax.random.normal(keys[10], (B, T, D), jnp.float32)

    y = jax.block_until_ready(jax.jit(rnn_forward)(x, params))
    assert y.shape == (B, T, 2 * H), y.shape

    y_ref = jax.block_until_ready(rnn_ref(x, params))
    assert jnp.allclose(y, y_ref, rtol=1e-4, atol=1e-4), (
        float(jnp.max(jnp.abs(y - y_ref))))

    print("KERNEL_OK")
</pallas_src>

<mosaic_0001>
module attributes {stable_mosaic.version = 11 : i64} {
  func.func @ln_relu_proj_kernel(%arg0: i32, %arg1: memref<16x32xf32, #tpu.memory_space<vmem>>, %arg2: memref<1x32xf32, #tpu.memory_space<vmem>>, %arg3: memref<1x32xf32, #tpu.memory_space<vmem>>, %arg4: memref<32x192xf32, #tpu.memory_space<vmem>>, %arg5: memref<1x192xf32, #tpu.memory_space<vmem>>, %arg6: memref<16x192xf32, #tpu.memory_space<vmem>>) attributes {dimension_semantics = [#tpu.dimension_semantics<parallel>], iteration_bounds = array<i64: 1>, scalar_prefetch = 0 : i64, scratch_operands = 0 : i64, tpu.core_type = #tpu.core_type<tc>, window_params = [{transform_indices = @transform_0, window_bounds = array<i64: 16, 32>}, {pipeline_mode = #tpu.pipeline_mode<synchronous>, transform_indices = @transform_1, window_bounds = array<i64: 1, 32>}, {pipeline_mode = #tpu.pipeline_mode<synchronous>, transform_indices = @transform_2, window_bounds = array<i64: 1, 32>}, {pipeline_mode = #tpu.pipeline_mode<synchronous>, transform_indices = @transform_3, window_bounds = array<i64: 32, 192>}, {pipeline_mode = #tpu.pipeline_mode<synchronous>, transform_indices = @transform_4, window_bounds = array<i64: 1, 192>}, {transform_indices = @transform_5, window_bounds = array<i64: 16, 192>}]} {
    %c0 = arith.constant 0 : index
    %c0_0 = arith.constant 0 : index
    %0 = vector.load %arg1[%c0, %c0_0] : memref<16x32xf32, #tpu.memory_space<vmem>>, vector<16x32xf32>
    %cst = arith.constant dense<0.000000e+00> : vector<16xf32>
    %1 = vector.multi_reduction <add>, %0, %cst [1] : vector<16x32xf32> to vector<16xf32>
    %2 = vector.shape_cast %1 : vector<16xf32> to vector<16x1xf32>
    %cst_1 = arith.constant 3.200000e+01 : f32
    %3 = vector.broadcast %cst_1 : f32 to vector<16x1xf32>
    %4 = arith.divf %2, %3 : vector<16x1xf32>
    %5 = vector.broadcast %4 : vector<16x1xf32> to vector<16x32xf32>
    %6 = arith.subf %0, %5 : vector<16x32xf32>
    %7 = arith.mulf %6, %6 : vector<16x32xf32>
    %cst_2 = arith.constant dense<0.000000e+00> : vector<16xf32>
    %8 = vector.multi_reduction <add>, %7, %cst_2 [1] : vector<16x32xf32> to vector<16xf32>
    %9 = vector.shape_cast %8 : vector<16xf32> to vector<16x1xf32>
    %cst_3 = arith.constant 3.200000e+01 : f32
    %10 = vector.broadcast %cst_3 : f32 to vector<16x1xf32>
    %11 = arith.divf %9, %10 : vector<16x1xf32>
    %12 = vector.broadcast %4 : vector<16x1xf32> to vector<16x32xf32>
    %13 = arith.subf %0, %12 : vector<16x32xf32>
    %cst_4 = arith.constant 9.99999974E-6 : f32
    %14 = vector.broadcast %cst_4 : f32 to vector<16x1xf32>
    %15 = arith.addf %11, %14 : vector<16x1xf32>
    %16 = math.rsqrt %15 : vector<16x1xf32>
    %17 = vector.broadcast %16 : vector<16x1xf32> to vector<16x32xf32>
    %18 = arith.mulf %13, %17 : vector<16x32xf32>
    %c0_5 = arith.constant 0 : index
    %c0_6 = arith.constant 0 : index
    %19 = vector.load %arg2[%c0_5, %c0_6] : memref<1x32xf32, #tpu.memory_space<vmem>>, vector<1x32xf32>
    %20 = vector.broadcast %19 : vector<1x32xf32> to vector<16x32xf32>
    %21 = arith.mulf %18, %20 : vector<16x32xf32>
    %c0_7 = arith.constant 0 : index
    %c0_8 = arith.constant 0 : index
    %22 = vector.load %arg3[%c0_7, %c0_8] : memref<1x32xf32, #tpu.memory_space<vmem>>, vector<1x32xf32>
    %23 = vector.broadcast %22 : vector<1x32xf32> to vector<16x32xf32>
    %24 = arith.addf %21, %23 : vector<16x32xf32>
    %cst_9 = arith.constant 0.000000e+00 : f32
    %25 = vector.broadcast %cst_9 : f32 to vector<16x32xf32>
    %26 = arith.maximumf %24, %25 : vector<16x32xf32>
    %c0_10 = arith.constant 0 : index
    %c0_11 = arith.constant 0 : index
    %27 = vector.load %arg4[%c0_10, %c0_11] : memref<32x192xf32, #tpu.memory_space<vmem>>, vector<32x192xf32>
    %cst_12 = arith.constant dense<0.000000e+00> : vector<16x192xf32>
    %28 = tpu.matmul %26, %27, %cst_12 {dimension_numbers = #tpu.dot_dimension_numbers<[1], [0], [0], [1], [0, 0, 1, 1], [], []>} : vector<16x32xf32>, vector<32x192xf32>, vector<16x192xf32> -> vector<16x192xf32>
    %c0_13 = arith.constant 0 : index
    %c0_14 = arith.constant 0 : index
    %29 = vector.load %arg5[%c0_13, %c0_14] : memref<1x192xf32, #tpu.memory_space<vmem>>, vector<1x192xf32>
    %30 = vector.broadcast %29 : vector<1x192xf32> to vector<16x192xf32>
    %31 = arith.addf %28, %30 : vector<16x192xf32>
    %c0_15 = arith.constant 0 : index
    %c0_16 = arith.constant 0 : index
    %32 = vector.load %arg6[%c0_15, %c0_16] : memref<16x192xf32, #tpu.memory_space<vmem>>, vector<16x192xf32>
    tpu.vector_store %arg6[%c0_15, %c0_16], %31 {strides = array<i32>} : memref<16x192xf32, #tpu.memory_space<vmem>>, vector<16x192xf32>,
    return
  }
  func.func @transform_0(%arg0: i32) -> (i32, i32) {
    %c0_i32 = arith.constant 0 : i32
    %c0_i32_0 = arith.constant 0 : i32
    return %arg0, %c0_i32 : i32, i32
  }
  func.func @transform_1(%arg0: i32) -> (i32, i32) {
    %c0_i32 = arith.constant 0 : i32
    %c0_i32_0 = arith.constant 0 : i32
    %c0_i32_1 = arith.constant 0 : i32
    return %c0_i32, %c0_i32_0 : i32, i32
  }
  func.func @transform_2(%arg0: i32) -> (i32, i32) {
    %c0_i32 = arith.constant 0 : i32
    %c0_i32_0 = arith.constant 0 : i32
    %c0_i32_1 = arith.constant 0 : i32
    return %c0_i32, %c0_i32_0 : i32, i32
  }
  func.func @transform_3(%arg0: i32) -> (i32, i32) {
    %c0_i32 = arith.constant 0 : i32
    %c0_i32_0 = arith.constant 0 : i32
    %c0_i32_1 = arith.constant 0 : i32
    return %c0_i32, %c0_i32_0 : i32, i32
  }
  func.func @transform_4(%arg0: i32) -> (i32, i32) {
    %c0_i32 = arith.constant 0 : i32
    %c0_i32_0 = arith.constant 0 : i32
    %c0_i32_1 = arith.constant 0 : i32
    return %c0_i32, %c0_i32_0 : i32, i32
  }
  func.func @transform_5(%arg0: i32) -> (i32, i32) {
    %c0_i32 = arith.constant 0 : i32
    %c0_i32_0 = arith.constant 0 : i32
    return %arg0, %c0_i32 : i32, i32
  }
}

module attributes {stable_mosaic.version = 11 : i64} {
  func.func @gru_bidir_kernel(%arg0: i32, %arg1: memref<8x2x192xf32, #tpu.memory_space<vmem>>, %arg2: memref<8x2x192xf32, #tpu.memory_space<vmem>>, %arg3: memref<32x192xf32, #tpu.memory_space<vmem>>, %arg4: memref<4x32xf32, #tpu.memory_space<vmem>>, %arg5: memref<8x2x32xf32, #tpu.memory_space<vmem>>, %arg6: memref<8x2x32xf32, #tpu.memory_space<vmem>>, %arg7: memref<4x32xf32, #tpu.memory_space<vmem>>) attributes {dimension_semantics = [#tpu.dimension_semantics<arbitrary>], iteration_bounds = array<i64: 1>, scalar_prefetch = 0 : i64, scratch_operands = 1 : i64, tpu.core_type = #tpu.core_type<tc>, window_params = [{transform_indices = @transform_0, window_bounds = array<i64: 8, 2, 192>}, {transform_indices = @transform_1, window_bounds = array<i64: 8, 2, 192>}, {pipeline_mode = #tpu.pipeline_mode<synchronous>, transform_indices = @transform_2, window_bounds = array<i64: 32, 192>}, {pipeline_mode = #tpu.pipeline_mode<synchronous>, transform_indices = @transform_3, window_bounds = array<i64: 4, 32>}, {transform_indices = @transform_4, window_bounds = array<i64: 8, 2, 32>}, {transform_indices = @transform_5, window_bounds = array<i64: 8, 2, 32>}]} {
    %c0_i32 = arith.constant 0 : i32
    %0 = arith.cmpi eq, %arg0, %c0_i32 : i32
    %1 = arith.extui %0 : i1 to i32
    %c0_i32_0 = arith.constant 0 : i32
    %2 = arith.cmpi ne, %1, %c0_i32_0 : i32
    scf.if %2 {
      %cst_112 = arith.constant 0.000000e+00 : f32
      %375 = vector.broadcast %cst_112 : f32 to vector<4x32xf32>
      %c0_113 = arith.constant 0 : index
      %c0_114 = arith.constant 0 : index
      %376 = vector.load %arg7[%c0_113, %c0_114] : memref<4x32xf32, #tpu.memory_space<vmem>>, vector<4x32xf32>
      tpu.vector_store %arg7[%c0_113, %c0_114], %375 {strides = array<i32>} : memref<4x32xf32, #tpu.memory_space<vmem>>, vector<4x32xf32>,
    } else {
    }
    %c0 = arith.constant 0 : index
    %c0_1 = arith.constant 0 : index
    %3 = vector.load %arg3[%c0, %c0_1] : memref<32x192xf32, #tpu.memory_space<vmem>>, vector<32x192xf32>
    %c0_2 = arith.constant 0 : index
    %c0_3 = arith.constant 0 : index
    %4 = vector.load %arg4[%c0_2, %c0_3] : memref<4x32xf32, #tpu.memory_space<vmem>>, vector<4x32xf32>
    %c0_4 = arith.constant 0 : index
    %c0_5 = arith.constant 0 : index
    %5 = vector.load %arg7[%c0_4, %c0_5] : memref<4x32xf32, #tpu.memory_space<vmem>>, vector<4x32xf32>
    %c0_i32_6 = arith.constant 0 : i32
    %6 = arith.index_cast %c0_i32_6 : i32 to index
    %c0_7 = arith.constant 0 : index
    %c0_8 = arith.constant 0 : index
    %7 = vector.load %arg1[%6, %c0_7, %c0_8] : memref<8x2x192xf32, #tpu.memory_space<vmem>>, vector<1x2x192xf32>
    %8 = vector.shape_cast %7 : vector<1x2x192xf32> to vector<2x192xf32>
    %c7_i32 = arith.constant 7 : i32
    %9 = arith.subi %c7_i32, %c0_i32_6 : i32
    %10 = arith.index_cast %9 : i32 to index
    %c0_9 = arith.constant 0 : index
    %c0_10 = arith.constant 0 : index
    %11 = vector.load %arg2[%10, %c0_9, %c0_10] : memref<8x2x192xf32, #tpu.memory_space<vmem>>, vector<1x2x192xf32>
    %12 = vector.shape_cast %11 : vector<1x2x192xf32> to vector<2x192xf32>
    %13 = vector.extract_strided_slice %8 {offsets = [0, 0], sizes = [2, 96], strides = [1, 1]} : vector<2x192xf32> to vector<2x96xf32>
    %14 = vector.extract_strided_slice %12 {offsets = [0, 96], sizes = [2, 96], strides = [1, 1]} : vector<2x192xf32> to vector<2x96xf32>
    %15 = tpu.concatenate %13, %14 in 0 : vector<2x96xf32>, vector<2x96xf32> -> vector<4x96xf32>
    %cst = arith.constant dense<0.000000e+00> : vector<4x192xf32>
    %16 = tpu.matmul %5, %3, %cst {dimension_numbers = #tpu.dot_dimension_numbers<[1], [0], [0], [1], [0, 0, 1, 1], [], []>} : vector<4x32xf32>, vector<32x192xf32>, vector<4x192xf32> -> vector<4x192xf32>
    %17 = vector.extract_strided_slice %16 {offsets = [0, 0], sizes = [2, 96], strides = [1, 1]} : vector<4x192xf32> to vector<2x96xf32>
    %18 = vector.extract_strided_slice %16 {offsets = [2, 96], sizes = [2, 96], strides = [1, 1]} : vector<4x192xf32> to vector<2x96xf32>
    %19 = tpu.concatenate %17, %18 in 0 : vector<2x96xf32>, vector<2x96xf32> -> vector<4x96xf32>
    %20 = vector.extract_strided_slice %15 {offsets = [0, 0], sizes = [4, 64], strides = [1, 1]} : vector<4x96xf32> to vector<4x64xf32>
    %21 = vector.extract_strided_slice %19 {offsets = [0, 0], sizes = [4, 64], strides = [1, 1]} : vector<4x96xf32> to vector<4x64xf32>
    %22 = arith.addf %20, %21 : vector<4x64xf32>
    %23 = arith.negf %22 : vector<4x64xf32>
    %24 = math.exp %23 : vector<4x64xf32>
    %cst_11 = arith.constant 1.000000e+00 : f32
    %25 = vector.broadcast %cst_11 : f32 to vector<4x64xf32>
    %26 = arith.addf %25, %24 : vector<4x64xf32>
    %27 = arith.divf %25, %26 : vector<4x64xf32>
    %28 = vector.extract_strided_slice %27 {offsets = [0, 0], sizes = [4, 32], strides = [1, 1]} : vector<4x64xf32> to vector<4x32xf32>
    %29 = vector.extract_strided_slice %27 {offsets = [0, 32], sizes = [4, 32], strides = [1, 1]} : vector<4x64xf32> to vector<4x32xf32>
    %30 = vector.extract_strided_slice %15 {offsets = [0, 64], sizes = [4, 32], strides = [1, 1]} : vector<4x96xf32> to vector<4x32xf32>
    %31 = vector.extract_strided_slice %19 {offsets = [0, 64], sizes = [4, 32], strides = [1, 1]} : vector<4x96xf32> to vector<4x32xf32>
    %32 = arith.addf %31, %4 : vector<4x32xf32>
    %33 = arith.mulf %28, %32 : vector<4x32xf32>
    %34 = arith.addf %30, %33 : vector<4x32xf32>
    %35 = math.tanh %34 : vector<4x32xf32>
    %cst_12 = arith.constant 1.000000e+00 : f32
    %36 = vector.broadcast %cst_12 : f32 to vector<4x32xf32>
    %37 = arith.subf %36, %29 : vector<4x32xf32>
    %38 = arith.mulf %37, %35 : vector<4x32xf32>
    %39 = arith.mulf %29, %5 : vector<4x32xf32>
    %40 = arith.addf %38, %39 : vector<4x32xf32>
    %41 = vector.extract_strided_slice %40 {offsets = [0, 0], sizes = [2, 32], strides = [1, 1]} : vector<4x32xf32> to vector<2x32xf32>
    %42 = arith.index_cast %c0_i32_6 : i32 to index
    %c0_13 = arith.constant 0 : index
    %c0_14 = arith.constant 0 : index
    %43 = vector.load %arg5[%42, %c0_13, %c0_14] : memref<8x2x32xf32, #tpu.memory_space<vmem>>, vector<1x2x32xf32>
    %44 = vector.shape_cast %43 : vector<1x2x32xf32> to vector<2x32xf32>
    %45 = vector.shape_cast %41 : vector<2x32xf32> to vector<1x2x32xf32>
    tpu.vector_store %arg5[%42, %c0_13, %c0_14], %45 {strides = array<i32>} : memref<8x2x32xf32, #tpu.memory_space<vmem>>, vector<1x2x32xf32>,
    %46 = vector.extract_strided_slice %40 {offsets = [2, 0], sizes = [2, 32], strides = [1, 1]} : vector<4x32xf32> to vector<2x32xf32>
    %c7_i32_15 = arith.constant 7 : i32
    %47 = arith.subi %c7_i32_15, %c0_i32_6 : i32
    %48 = arith.index_cast %47 : i32 to index
    %c0_16 = arith.constant 0 : index
    %c0_17 = arith.constant 0 : index
    %49 = vector.load %arg6[%48, %c0_16, %c0_17] : memref<8x2x32xf32, #tpu.memory_space<vmem>>, vector<1x2x32xf32>
    %50 = vector.shape_cast %49 : vector<1x2x32xf32> to vector<2x32xf32>
    %51 = vector.shape_cast %46 : vector<2x32xf32> to vector<1x2x32xf32>
    tpu.vector_store %arg6[%48, %c0_16, %c0_17], %51 {strides = array<i32>} : memref<8x2x32xf32, #tpu.memory_space<vmem>>, vector<1x2x32xf32>,
    %c1_i32 = arith.constant 1 : i32
    %52 = arith.index_cast %c1_i32 : i32 to index
    %c0_18 = arith.constant 0 : index
    %c0_19 = arith.constant 0 : index
    %53 = vector.load %arg1[%52, %c0_18, %c0_19] : memref<8x2x192xf32, #tpu.memory_space<vmem>>, vector<1x2x192xf32>
    %54 = vector.shape_cast %53 : vector<1x2x192xf32> to vector<2x192xf32>
    %c7_i32_20 = arith.constant 7 : i32
    %55 = arith.subi %c7_i32_20, %c1_i32 : i32
    %56 = arith.index_cast %55 : i32 to index
    %c0_21 = arith.constant 0 : index
    %c0_22 = arith.constant 0 : index
    %57 = vector.load %arg2[%56, %c0_21, %c0_22] : memref<8x2x192xf32, #tpu.memory_space<vmem>>, vector<1x2x192xf32>
    %58 = vector.shape_cast %57 : vector<1x2x192xf32> to vector<2x192xf32>
    %59 = vector.extract_strided_slice %54 {offsets = [0, 0], sizes = [2, 96], strides = [1, 1]} : vector<2x192xf32> to vector<2x96xf32>
    %60 = vector.extract_strided_slice %58 {offsets = [0, 96], sizes = [2, 96], strides = [1, 1]} : vector<2x192xf32> to vector<2x96xf32>
    %61 = tpu.concatenate %59, %60 in 0 : vector<2x96xf32>, vector<2x96xf32> -> vector<4x96xf32>
    %cst_23 = arith.constant dense<0.000000e+00> : vector<4x192xf32>
    %62 = tpu.matmul %40, %3, %cst_23 {dimension_numbers = #tpu.dot_dimension_numbers<[1], [0], [0], [1], [0, 0, 1, 1], [], []>} : vector<4x32xf32>, vector<32x192xf32>, vector<4x192xf32> -> vector<4x192xf32>
    %63 = vector.extract_strided_slice %62 {offsets = [0, 0], sizes = [2, 96], strides = [1, 1]} : vector<4x192xf32> to vector<2x96xf32>
    %64 = vector.extract_strided_slice %62 {offsets = [2, 96], sizes = [2, 96], strides = [1, 1]} : vector<4x192xf32> to vector<2x96xf32>
    %65 = tpu.concatenate %63, %64 in 0 : vector<2x96xf32>, vector<2x96xf32> -> vector<4x96xf32>
    %66 = vector.extract_strided_slice %61 {offsets = [0, 0], sizes = [4, 64], strides = [1, 1]} : vector<4x96xf32> to vector<4x64xf32>
    %67 = vector.extract_strided_slice %65 {offsets = [0, 0], sizes = [4, 64], strides = [1, 1]} : vector<4x96xf32> to vector<4x64xf32>
    %68 = arith.addf %66, %67 : vector<4x64xf32>
    %69 = arith.negf %68 : vector<4x64xf32>
    %70 = math.exp %69 : vector<4x64xf32>
    %cst_24 = arith.constant 1.000000e+00 : f32
    %71 = vector.broadcast %cst_24 : f32 to vector<4x64xf32>
    %72 = arith.addf %71, %70 : vector<4x64xf32>
    %73 = arith.divf %71, %72 : vector<4x64xf32>
    %74 = vector.extract_strided_slice %73 {offsets = [0, 0], sizes = [4, 32], strides = [1, 1]} : vector<4x64xf32> to vector<4x32xf32>
    %75 = vector.extract_strided_slice %73 {offsets = [0, 32], sizes = [4, 32], strides = [1, 1]} : vector<4x64xf32> to vector<4x32xf32>
    %76 = vector.extract_strided_slice %61 {offsets = [0, 64], sizes = [4, 32], strides = [1, 1]} : vector<4x96xf32> to vector<4x32xf32>
    %77 = vector.extract_strided_slice %65 {offsets = [0, 64], sizes = [4, 32], strides = [1, 1]} : vector<4x96xf32> to vector<4x32xf32>
    %78 = arith.addf %77, %4 : vector<4x32xf32>
    %79 = arith.mulf %74, %78 : vector<4x32xf32>
    %80 = arith.addf %76, %79 : vector<4x32xf32>
    %81 = math.tanh %80 : vector<4x32xf32>
    %cst_25 = arith.constant 1.000000e+00 : f32
    %82 = vector.broadcast %cst_25 : f32 to vector<4x32xf32>
    %83 = arith.subf %82, %75 : vector<4x32xf32>
    %84 = arith.mulf %83, %81 : vector<4x32xf32>
    %85 = arith.mulf %75, %40 : vector<4x32xf32>
    %86 = arith.addf %84, %85 : vector<4x32xf32>
    %87 = vector.extract_strided_slice %86 {offsets = [0, 0], sizes = [2, 32], strides = [1, 1]} : vector<4x32xf32> to vector<2x32xf32>
    %88 = arith.index_cast %c1_i32 : i32 to index
    %c0_26 = arith.constant 0 : index
    %c0_27 = arith.constant 0 : index
    %89 = vector.load %arg5[%88, %c0_26, %c0_27] : memref<8x2x32xf32, #tpu.memory_space<vmem>>, vector<1x2x32xf32>
    %90 = vector.shape_cast %89 : vector<1x2x32xf32> to vector<2x32xf32>
    %91 = vector.shape_cast %87 : vector<2x32xf32> to vector<1x2x32xf32>
    tpu.vector_store %arg5[%88, %c0_26, %c0_27], %91 {strides = array<i32>} : memref<8x2x32xf32, #tpu.memory_space<vmem>>, vector<1x2x32xf32>,
    %92 = vector.extract_strided_slice %86 {offsets = [2, 0], sizes = [2, 32], strides = [1, 1]} : vector<4x32xf32> to vector<2x32xf32>
    %c7_i32_28 = arith.constant 7 : i32
    %93 = arith.subi %c7_i32_28, %c1_i32 : i32
    %94 = arith.index_cast %93 : i32 to index
    %c0_29 = arith.constant 0 : index
    %c0_30 = arith.constant 0 : index
    %95 = vector.load %arg6[%94, %c0_29, %c0_30] : memref<8x2x32xf32, #tpu.memory_space<vmem>>, vector<1x2x32xf32>
    %96 = vector.shape_cast %95 : vector<1x2x32xf32> to vector<2x32xf32>
    %97 = vector.shape_cast %92 : vector<2x32xf32> to vector<1x2x32xf32>
    tpu.vector_store %arg6[%94, %c0_29, %c0_30], %97 {strides = array<i32>} : memref<8x2x32xf32, #tpu.memory_space<vmem>>, vector<1x2x32xf32>,
    %c2_i32 = arith.constant 2 : i32
    %98 = arith.index_cast %c2_i32 : i32 to index
    %c0_31 = arith.constant 0 : index
    %c0_32 = arith.constant 0 : index
    %99 = vector.load %arg1[%98, %c0_31, %c0_32] : memref<8x2x192xf32, #tpu.memory_space<vmem>>, vector<1x2x192xf32>
    %100 = vector.shape_cast %99 : vector<1x2x192xf32> to vector<2x192xf32>
    %c7_i32_33 = arith.constant 7 : i32
    %101 = arith.subi %c7_i32_33, %c2_i32 : i32
    %102 = arith.index_cast %101 : i32 to index
    %c0_34 = arith.constant 0 : index
    %c0_35 = arith.constant 0 : index
    %103 = vector.load %arg2[%102, %c0_34, %c0_35] : memref<8x2x192xf32, #tpu.memory_space<vmem>>, vector<1x2x192xf32>
    %104 = vector.shape_cast %103 : vector<1x2x192xf32> to vector<2x192xf32>
    %105 = vector.extract_strided_slice %100 {offsets = [0, 0], sizes = [2, 96], strides = [1, 1]} : vector<2x192xf32> to vector<2x96xf32>
    %106 = vector.extract_strided_slice %104 {offsets = [0, 96], sizes = [2, 96], strides = [1, 1]} : vector<2x192xf32> to vector<2x96xf32>
    %107 = tpu.concatenate %105, %106 in 0 : vector<2x96xf32>, vector<2x96xf32> -> vector<4x96xf32>
    %cst_36 = arith.constant dense<0.000000e+00> : vector<4x192xf32>
    %108 = tpu.matmul %86, %3, %cst_36 {dimension_numbers = #tpu.dot_dimension_numbers<[1], [0], [0], [1], [0, 0, 1, 1], [], []>} : vector<4x32xf32>, vector<32x192xf32>, vector<4x192xf32> -> vector<4x192xf32>
    %109 = vector.extract_strided_slice %108 {offsets = [0, 0], sizes = [2, 96], strides = [1, 1]} : vector<4x192xf32> to vector<2x96xf32>
    %110 = vector.extract_strided_slice %108 {offsets = [2, 96], sizes = [2, 96], strides = [1, 1]} : vector<4x192xf32> to vector<2x96xf32>
    %111 = tpu.concatenate %109, %110 in 0 : vector<2x96xf32>, vector<2x96xf32> -> vector<4x96xf32>
    %112 = vector.extract_strided_slice %107 {offsets = [0, 0], sizes = [4, 64], strides = [1, 1]} : vector<4x96xf32> to vector<4x64xf32>
    %113 = vector.extract_strided_slice %111 {offsets = [0, 0], sizes = [4, 64], strides = [1, 1]} : vector<4x96xf32> to vector<4x64xf32>
    %114 = arith.addf %112, %113 : vector<4x64xf32>
    %115 = arith.negf %114 : vector<4x64xf32>
    %116 = math.exp %115 : vector<4x64xf32>
    %cst_37 = arith.constant 1.000000e+00 : f32
    %117 = vector.broadcast %cst_37 : f32 to vector<4x64xf32>
    %118 = arith.addf %117, %116 : vector<4x64xf32>
    %119 = arith.divf %117, %118 : vector<4x64xf32>
    %120 = vector.extract_strided_slice %119 {offsets = [0, 0], sizes = [4, 32], strides = [1, 1]} : vector<4x64xf32> to vector<4x32xf32>
    %121 = vector.extract_strided_slice %119 {offsets = [0, 32], sizes = [4, 32], strides = [1, 1]} : vector<4x64xf32> to vector<4x32xf32>
    %122 = vector.extract_strided_slice %107 {offsets = [0, 64], sizes = [4, 32], strides = [1, 1]} : vector<4x96xf32> to vector<4x32xf32>
    %123 = vector.extract_strided_slice %111 {offsets = [0, 64], sizes = [4, 32], strides = [1, 1]} : vector<4x96xf32> to vector<4x32xf32>
    %124 = arith.addf %123, %4 : vector<4x32xf32>
    %125 = arith.mulf %120, %124 : vector<4x32xf32>
    %126 = arith.addf %122, %125 : vector<4x32xf32>
    %127 = math.tanh %126 : vector<4x32xf32>
    %cst_38 = arith.constant 1.000000e+00 : f32
    %128 = vector.broadcast %cst_38 : f32 to vector<4x32xf32>
    %129 = arith.subf %128, %121 : vector<4x32xf32>
    %130 = arith.mulf %129, %127 : vector<4x32xf32>
    %131 = arith.mulf %121, %86 : vector<4x32xf32>
    %132 = arith.addf %130, %131 : vector<4x32xf32>
    %133 = vector.extract_strided_slice %132 {offsets = [0, 0], sizes = [2, 32], strides = [1, 1]} : vector<4x32xf32> to vector<2x32xf32>
    %134 = arith.index_cast %c2_i32 : i32 to index
    %c0_39 = arith.constant 0 : index
    %c0_40 = arith.constant 0 : index
    %135 = vector.load %arg5[%134, %c0_39, %c0_40] : memref<8x2x32xf32, #tpu.memory_space<vmem>>, vector<1x2x32xf32>
    %136 = vector.shape_cast %135 : vector<1x2x32xf32> to vector<2x32xf32>
    %137 = vector.shape_cast %133 : vector<2x32xf32> to vector<1x2x32xf32>
    tpu.vector_store %arg5[%134, %c0_39, %c0_40], %137 {strides = array<i32>} : memref<8x2x32xf32, #tpu.memory_space<vmem>>, vector<1x2x32xf32>,
    %138 = vector.extract_strided_slice %132 {offsets = [2, 0], sizes = [2, 32], strides = [1, 1]} : vector<4x32xf32> to vector<2x32xf32>
    %c7_i32_41 = arith.constant 7 : i32
    %139 = arith.subi %c7_i32_41, %c2_i32 : i32
    %140 = arith.index_cast %139 : i32 to index
    %c0_42 = arith.constant 0 : index
    %c0_43 = arith.constant 0 : index
    %141 = vector.load %arg6[%140, %c0_42, %c0_43] : memref<8x2x32xf32, #tpu.memory_space<vmem>>, vector<1x2x32xf32>
    %142 = vector.shape_cast %141 : vector<1x2x32xf32> to vector<2x32xf32>
    %143 = vector.shape_cast %138 : vector<2x32xf32> to vector<1x2x32xf32>
    tpu.vector_store %arg6[%140, %c0_42, %c0_43], %143 {strides = array<i32>} : memref<8x2x32xf32, #tpu.memory_space<vmem>>, vector<1x2x32xf32>,
    %c3_i32 = arith.constant 3 : i32
    %144 = arith.index_cast %c3_i32 : i32 to index
    %c0_44 = arith.constant 0 : index
    %c0_45 = arith.constant 0 : index
    %145 = vector.load %arg1[%144, %c0_44, %c0_45] : memref<8x2x192xf32, #tpu.memory_space<vmem>>, vector<1x2x192xf32>
    %146 = vector.shape_cast %145 : vector<1x2x192xf32> to vector<2x192xf32>
    %c7_i32_46 = arith.constant 7 : i32
    %147 = arith.subi %c7_i32_46, %c3_i32 : i32
    %148 = arith.index_cast %147 : i32 to index
    %c0_47 = arith.constant 0 : index
    %c0_48 = arith.constant 0 : index
    %149 = vector.load %arg2[%148, %c0_47, %c0_48] : memref<8x2x192xf32, #tpu.memory_space<vmem>>, vector<1x2x192xf32>
    %150 = vector.shape_cast %149 : vector<1x2x192xf32> to vector<2x192xf32>
    %151 = vector.extract_strided_slice %146 {offsets = [0, 0], sizes = [2, 96], strides = [1, 1]} : vector<2x192xf32> to vector<2x96xf32>
    %152 = vector.extract_strided_slice %150 {offsets = [0, 96], sizes = [2, 96], strides = [1, 1]} : vector<2x192xf32> to vector<2x96xf32>
    %153 = tpu.concatenate %151, %152 in 0 : vector<2x96xf32>, vector<2x96xf32> -> vector<4x96xf32>
    %cst_49 = arith.constant dense<0.000000e+00> : vector<4x192xf32>
    %154 = tpu.matmul %132, %3, %cst_49 {dimension_numbers = #tpu.dot_dimension_numbers<[1], [0], [0], [1], [0, 0, 1, 1], [], []>} : vector<4x32xf32>, vector<32x192xf32>, vector<4x192xf32> -> vector<4x192xf32>
    %155 = vector.extract_strided_slice %154 {offsets = [0, 0], sizes = [2, 96], strides = [1, 1]} : vector<4x192xf32> to vector<2x96xf32>
    %156 = vector.extract_strided_slice %154 {offsets = [2, 96], sizes = [2, 96], strides = [1, 1]} : vector<4x192xf32> to vector<2x96xf32>
    %157 = tpu.concatenate %155, %156 in 0 : vector<2x96xf32>, vector<2x96xf32> -> vector<4x96xf32>
    %158 = vector.extract_strided_slice %153 {offsets = [0, 0], sizes = [4, 64], strides = [1, 1]} : vector<4x96xf32> to vector<4x64xf32>
    %159 = vector.extract_strided_slice %157 {offsets = [0, 0], sizes = [4, 64], strides = [1, 1]} : vector<4x96xf32> to vector<4x64xf32>
    %160 = arith.addf %158, %159 : vector<4x64xf32>
    %161 = arith.negf %160 : vector<4x64xf32>
    %162 = math.exp %161 : vector<4x64xf32>
    %cst_50 = arith.constant 1.000000e+00 : f32
    %163 = vector.broadcast %cst_50 : f32 to vector<4x64xf32>
    %164 = arith.addf %163, %162 : vector<4x64xf32>
    %165 = arith.divf %163, %164 : vector<4x64xf32>
    %166 = vector.extract_strided_slice %165 {offsets = [0, 0], sizes = [4, 32], strides = [1, 1]} : vector<4x64xf32> to vector<4x32xf32>
    %167 = vector.extract_strided_slice %165 {offsets = [0, 32], sizes = [4, 32], strides = [1, 1]} : vector<4x64xf32> to vector<4x32xf32>
    %168 = vector.extract_strided_slice %153 {offsets = [0, 64], sizes = [4, 32], strides = [1, 1]} : vector<4x96xf32> to vector<4x32xf32>
    %169 = vector.extract_strided_slice %157 {offsets = [0, 64], sizes = [4, 32], strides = [1, 1]} : vector<4x96xf32> to vector<4x32xf32>
    %170 = arith.addf %169, %4 : vector<4x32xf32>
    %171 = arith.mulf %166, %170 : vector<4x32xf32>
    %172 = arith.addf %168, %171 : vector<4x32xf32>
    %173 = math.tanh %172 : vector<4x32xf32>
    %cst_51 = arith.constant 1.000000e+00 : f32
    %174 = vector.broadcast %cst_51 : f32 to vector<4x32xf32>
    %175 = arith.subf %174, %167 : vector<4x32xf32>
    %176 = arith.mulf %175, %173 : vector<4x32xf32>
    %177 = arith.mulf %167, %132 : vector<4x32xf32>
    %178 = arith.addf %176, %177 : vector<4x32xf32>
    %179 = vector.extract_strided_slice %178 {offsets = [0, 0], sizes = [2, 32], strides = [1, 1]} : vector<4x32xf32> to vector<2x32xf32>
    %180 = arith.index_cast %c3_i32 : i32 to index
    %c0_52 = arith.constant 0 : index
    %c0_53 = arith.constant 0 : index
    %181 = vector.load %arg5[%180, %c0_52, %c0_53] : memref<8x2x32xf32, #tpu.memory_space<vmem>>, vector<1x2x32xf32>
    %182 = vector.shape_cast %181 : vector<1x2x32xf32> to vector<2x32xf32>
    %183 = vector.shape_cast %179 : vector<2x32xf32> to vector<1x2x32xf32>
    tpu.vector_store %arg5[%180, %c0_52, %c0_53], %183 {strides = array<i32>} : memref<8x2x32xf32, #tpu.memory_space<vmem>>, vector<1x2x32xf32>,
    %184 = vector.extract_strided_slice %178 {offsets = [2, 0], sizes = [2, 32], strides = [1, 1]} : vector<4x32xf32> to vector<2x32xf32>
    %c7_i32_54 = arith.constant 7 : i32
    %185 = arith.subi %c7_i32_54, %c3_i32 : i32
    %186 = arith.index_cast %185 : i32 to index
    %c0_55 = arith.constant 0 : index
    %c0_56 = arith.constant 0 : index
    %187 = vector.load %arg6[%186, %c0_55, %c0_56] : memref<8x2x32xf32, #tpu.memory_space<vmem>>, vector<1x2x32xf32>
    %188 = vector.shape_cast %187 : vector<1x2x32xf32> to vector<2x32xf32>
    %189 = vector.shape_cast %184 : vector<2x32xf32> to vector<1x2x32xf32>
    tpu.vector_store %arg6[%186, %c0_55, %c0_56], %189 {strides = array<i32>} : memref<8x2x32xf32, #tpu.memory_space<vmem>>, vector<1x2x32xf32>,
    %c4_i32 = arith.constant 4 : i32
    %190 = arith.index_cast %c4_i32 : i32 to index
    %c0_57 = arith.constant 0 : index
    %c0_58 = arith.constant 0 : index
    %191 = vector.load %arg1[%190, %c0_57, %c0_58] : memref<8x2x192xf32, #tpu.memory_space<vmem>>, vector<1x2x192xf32>
    %192 = vector.shape_cast %191 : vector<1x2x192xf32> to vector<2x192xf32>
    %c7_i32_59 = arith.constant 7 : i32
    %193 = arith.subi %c7_i32_59, %c4_i32 : i32
    %194 = arith.index_cast %193 : i32 to index
    %c0_60 = arith.constant 0 : index
    %c0_61 = arith.constant 0 : index
    %195 = vector.load %arg2[%194, %c0_60, %c0_61] : memref<8x2x192xf32, #tpu.memory_space<vmem>>, vector<1x2x192xf32>
    %196 = vector.shape_cast %195 : vector<1x2x192xf32> to vector<2x192xf32>
    %197 = vector.extract_strided_slice %192 {offsets = [0, 0], sizes = [2, 96], strides = [1, 1]} : vector<2x192xf32> to vector<2x96xf32>
    %198 = vector.extract_strided_slice %196 {offsets = [0, 96], sizes = [2, 96], strides = [1, 1]} : vector<2x192xf32> to vector<2x96xf32>
    %199 = tpu.concatenate %197, %198 in 0 : vector<2x96xf32>, vector<2x96xf32> -> vector<4x96xf32>
    %cst_62 = arith.constant dense<0.000000e+00> : vector<4x192xf32>
    %200 = tpu.matmul %178, %3, %cst_62 {dimension_numbers = #tpu.dot_dimension_numbers<[1], [0], [0], [1], [0, 0, 1, 1], [], []>} : vector<4x32xf32>, vector<32x192xf32>, vector<4x192xf32> -> vector<4x192xf32>
    %201 = vector.extract_strided_slice %200 {offsets = [0, 0], sizes = [2, 96], strides = [1, 1]} : vector<4x192xf32> to vector<2x96xf32>
    %202 = vector.extract_strided_slice %200 {offsets = [2, 96], sizes = [2, 96], strides = [1, 1]} : vector<4x192xf32> to vector<2x96xf32>
    %203 = tpu.concatenate %201, %202 in 0 : vector<2x96xf32>, vector<2x96xf32> -> vector<4x96xf32>
    %204 = vector.extract_strided_slice %199 {offsets = [0, 0], sizes = [4, 64], strides = [1, 1]} : vector<4x96xf32> to vector<4x64xf32>
    %205 = vector.extract_strided_slice %203 {offsets = [0, 0], sizes = [4, 64], strides = [1, 1]} : vector<4x96xf32> to vector<4x64xf32>
    %206 = arith.addf %204, %205 : vector<4x64xf32>
    %207 = arith.negf %206 : vector<4x64xf32>
    %208 = math.exp %207 : vector<4x64xf32>
    %cst_63 = arith.constant 1.000000e+00 : f32
    %209 = vector.broadcast %cst_63 : f32 to vector<4x64xf32>
    %210 = arith.addf %209, %208 : vector<4x64xf32>
    %211 = arith.divf %209, %210 : vector<4x64xf32>
    %212 = vector.extract_strided_slice %211 {offsets = [0, 0], sizes = [4, 32], strides = [1, 1]} : vector<4x64xf32> to vector<4x32xf32>
    %213 = vector.extract_strided_slice %211 {offsets = [0, 32], sizes = [4, 32], strides = [1, 1]} : vector<4x64xf32> to vector<4x32xf32>
    %214 = vector.extract_strided_slice %199 {offsets = [0, 64], sizes = [4, 32], strides = [1, 1]} : vector<4x96xf32> to vector<4x32xf32>
    %215 = vector.extract_strided_slice %203 {offsets = [0, 64], sizes = [4, 32], strides = [1, 1]} : vector<4x96xf32> to vector<4x32xf32>
    %216 = arith.addf %215, %4 : vector<4x32xf32>
    %217 = arith.mulf %212, %216 : vector<4x32xf32>
    %218 = arith.addf %214, %217 : vector<4x32xf32>
    %219 = math.tanh %218 : vector<4x32xf32>
    %cst_64 = arith.constant 1.000000e+00 : f32
    %220 = vector.broadcast %cst_64 : f32 to vector<4x32xf32>
    %221 = arith.subf %220, %213 : vector<4x32xf32>
    %222 = arith.mulf %221, %219 : vector<4x32xf32>
    %223 = arith.mulf %213, %178 : vector<4x32xf32>
    %224 = arith.addf %222, %223 : vector<4x32xf32>
    %225 = vector.extract_strided_slice %224 {offsets = [0, 0], sizes = [2, 32], strides = [1, 1]} : vector<4x32xf32> to vector<2x32xf32>
    %226 = arith.index_cast %c4_i32 : i32 to index
    %c0_65 = arith.constant 0 : index
    %c0_66 = arith.constant 0 : index
    %227 = vector.load %arg5[%226, %c0_65, %c0_66] : memref<8x2x32xf32, #tpu.memory_space<vmem>>, vector<1x2x32xf32>
    %228 = vector.shape_cast %227 : vector<1x2x32xf32> to vector<2x32xf32>
    %229 = vector.shape_cast %225 : vector<2x32xf32> to vector<1x2x32xf32>
    tpu.vector_store %arg5[%226, %c0_65, %c0_66], %229 {strides = array<i32>} : memref<8x2x32xf32, #tpu.memory_space<vmem>>, vector<1x2x32xf32>,
    %230 = vector.extract_strided_slice %224 {offsets = [2, 0], sizes = [2, 32], strides = [1, 1]} : vector<4x32xf32> to vector<2x32xf32>
    %c7_i32_67 = arith.constant 7 : i32
    %231 = arith.subi %c7_i32_67, %c4_i32 : i32
    %232 = arith.index_cast %231 : i32 to index
    %c0_68 = arith.constant 0 : index
    %c0_69 = arith.constant 0 : index
    %233 = vector.load %arg6[%232, %c0_68, %c0_69] : memref<8x2x32xf32, #tpu.memory_space<vmem>>, vector<1x2x32xf32>
    %234 = vector.shape_cast %233 : vector<1x2x32xf32> to vector<2x32xf32>
    %235 = vector.shape_cast %230 : vector<2x32xf32> to vector<1x2x32xf32>
    tpu.vector_store %arg6[%232, %c0_68, %c0_69], %235 {strides = array<i32>} : memref<8x2x32xf32, #tpu.memory_space<vmem>>, vector<1x2x32xf32>,
    %c5_i32 = arith.constant 5 : i32
    %236 = arith.index_cast %c5_i32 : i32 to index
    %c0_70 = arith.constant 0 : index
    %c0_71 = arith.constant 0 : index
    %237 = vector.load %arg1[%236, %c0_70, %c0_71] : memref<8x2x192xf32, #tpu.memory_space<vmem>>, vector<1x2x192xf32>
    %238 = vector.shape_cast %237 : vector<1x2x192xf32> to vector<2x192xf32>
    %c7_i32_72 = arith.constant 7 : i32
    %239 = arith.subi %c7_i32_72, %c5_i32 : i32
    %240 = arith.index_cast %239 : i32 to index
    %c0_73 = arith.constant 0 : index
    %c0_74 = arith.constant 0 : index
    %241 = vector.load %arg2[%240, %c0_73, %c0_74] : memref<8x2x192xf32, #tpu.memory_space<vmem>>, vector<1x2x192xf32>
    %242 = vector.shape_cast %241 : vector<1x2x192xf32> to vector<2x192xf32>
    %243 = vector.extract_strided_slice %238 {offsets = [0, 0], sizes = [2, 96], strides = [1, 1]} : vector<2x192xf32> to vector<2x96xf32>
    %244 = vector.extract_strided_slice %242 {offsets = [0, 96], sizes = [2, 96], strides = [1, 1]} : vector<2x192xf32> to vector<2x96xf32>
    %245 = tpu.concatenate %243, %244 in 0 : vector<2x96xf32>, vector<2x96xf32> -> vector<4x96xf32>
    %cst_75 = arith.constant dense<0.000000e+00> : vector<4x192xf32>
    %246 = tpu.matmul %224, %3, %cst_75 {dimension_numbers = #tpu.dot_dimension_numbers<[1], [0], [0], [1], [0, 0, 1, 1], [], []>} : vector<4x32xf32>, vector<32x192xf32>, vector<4x192xf32> -> vector<4x192xf32>
    %247 = vector.extract_strided_slice %246 {offsets = [0, 0], sizes = [2, 96], strides = [1, 1]} : vector<4x192xf32> to vector<2x96xf32>
    %248 = vector.extract_strided_slice %246 {offsets = [2, 96], sizes = [2, 96], strides = [1, 1]} : vector<4x192xf32> to vector<2x96xf32>
    %249 = tpu.concatenate %247, %248 in 0 : vector<2x96xf32>, vector<2x96xf32> -> vector<4x96xf32>
    %250 = vector.extract_strided_slice %245 {offsets = [0, 0], sizes = [4, 64], strides = [1, 1]} : vector<4x96xf32> to vector<4x64xf32>
    %251 = vector.extract_strided_slice %249 {offsets = [0, 0], sizes = [4, 64], strides = [1, 1]} : vector<4x96xf32> to vector<4x64xf32>
    %252 = arith.addf %250, %251 : vector<4x64xf32>
    %253 = arith.negf %252 : vector<4x64xf32>
    %254 = math.exp %253 : vector<4x64xf32>
    %cst_76 = arith.constant 1.000000e+00 : f32
    %255 = vector.broadcast %cst_76 : f32 to vector<4x64xf32>
    %256 = arith.addf %255, %254 : vector<4x64xf32>
    %257 = arith.divf %255, %256 : vector<4x64xf32>
    %258 = vector.extract_strided_slice %257 {offsets = [0, 0], sizes = [4, 32], strides = [1, 1]} : vector<4x64xf32> to vector<4x32xf32>
    %259 = vector.extract_strided_slice %257 {offsets = [0, 32], sizes = [4, 32], strides = [1, 1]} : vector<4x64xf32> to vector<4x32xf32>
    %260 = vector.extract_strided_slice %245 {offsets = [0, 64], sizes = [4, 32], strides = [1, 1]} : vector<4x96xf32> to vector<4x32xf32>
    %261 = vector.extract_strided_slice %249 {offsets = [0, 64], sizes = [4, 32], strides = [1, 1]} : vector<4x96xf32> to vector<4x32xf32>
    %262 = arith.addf %261, %4 : vector<4x32xf32>
    %263 = arith.mulf %258, %262 : vector<4x32xf32>
    %264 = arith.addf %260, %263 : vector<4x32xf32>
    %265 = math.tanh %264 : vector<4x32xf32>
    %cst_77 = arith.constant 1.000000e+00 : f32
    %266 = vector.broadcast %cst_77 : f32 to vector<4x32xf32>
    %267 = arith.subf %266, %259 : vector<4x32xf32>
    %268 = arith.mulf %267, %265 : vector<4x32xf32>
    %269 = arith.mulf %259, %224 : vector<4x32xf32>
    %270 = arith.addf %268, %269 : vector<4x32xf32>
    %271 = vector.extract_strided_slice %270 {offsets = [0, 0], sizes = [2, 32], strides = [1, 1]} : vector<4x32xf32> to vector<2x32xf32>
    %272 = arith.index_cast %c5_i32 : i32 to index
    %c0_78 = arith.constant 0 : index
    %c0_79 = arith.constant 0 : index
    %273 = vector.load %arg5[%272, %c0_78, %c0_79] : memref<8x2x32xf32, #tpu.memory_space<vmem>>, vector<1x2x32xf32>
    %274 = vector.shape_cast %273 : vector<1x2x32xf32> to vector<2x32xf32>
    %275 = vector.shape_cast %271 : vector<2x32xf32> to vector<1x2x32xf32>
    tpu.vector_store %arg5[%272, %c0_78, %c0_79], %275 {strides = array<i32>} : memref<8x2x32xf32, #tpu.memory_space<vmem>>, vector<1x2x32xf32>,
    %276 = vector.extract_strided_slice %270 {offsets = [2, 0], sizes = [2, 32], strides = [1, 1]} : vector<4x32xf32> to vector<2x32xf32>
    %c7_i32_80 = arith.constant 7 : i32
    %277 = arith.subi %c7_i32_80, %c5_i32 : i32
    %278 = arith.index_cast %277 : i32 to index
    %c0_81 = arith.constant 0 : index
    %c0_82 = arith.constant 0 : index
    %279 = vector.load %arg6[%278, %c0_81, %c0_82] : memref<8x2x32xf32, #tpu.memory_space<vmem>>, vector<1x2x32xf32>
    %280 = vector.shape_cast %279 : vector<1x2x32xf32> to vector<2x32xf32>
    %281 = vector.shape_cast %276 : vector<2x32xf32> to vector<1x2x32xf32>
    tpu.vector_store %arg6[%278, %c0_81, %c0_82], %281 {strides = array<i32>} : memref<8x2x32xf32, #tpu.memory_space<vmem>>, vector<1x2x32xf32>,
    %c6_i32 = arith.constant 6 : i32
    %282 = arith.index_cast %c6_i32 : i32 to index
    %c0_83 = arith.constant 0 : index
    %c0_84 = arith.constant 0 : index
    %283 = vector.load %arg1[%282, %c0_83, %c0_84] : memref<8x2x192xf32, #tpu.memory_space<vmem>>, vector<1x2x192xf32>
    %284 = vector.shape_cast %283 : vector<1x2x192xf32> to vector<2x192xf32>
    %c7_i32_85 = arith.constant 7 : i32
    %285 = arith.subi %c7_i32_85, %c6_i32 : i32
    %286 = arith.index_cast %285 : i32 to index
    %c0_86 = arith.constant 0 : index
    %c0_87 = arith.constant 0 : index
    %287 = vector.load %arg2[%286, %c0_86, %c0_87] : memref<8x2x192xf32, #tpu.memory_space<vmem>>, vector<1x2x192xf32>
    %288 = vector.shape_cast %287 : vector<1x2x192xf32> to vector<2x192xf32>
    %289 = vector.extract_strided_slice %284 {offsets = [0, 0], sizes = [2, 96], strides = [1, 1]} : vector<2x192xf32> to vector<2x96xf32>
    %290 = vector.extract_strided_slice %288 {offsets = [0, 96], sizes = [2, 96], strides = [1, 1]} : vector<2x192xf32> to vector<2x96xf32>
    %291 = tpu.concatenate %289, %290 in 0 : vector<2x96xf32>, vector<2x96xf32> -> vector<4x96xf32>
    %cst_88 = arith.constant dense<0.000000e+00> : vector<4x192xf32>
    %292 = tpu.matmul %270, %3, %cst_88 {dimension_numbers = #tpu.dot_dimension_numbers<[1], [0], [0], [1], [0, 0, 1, 1], [], []>} : vector<4x32xf32>, vector<32x192xf32>, vector<4x192xf32> -> vector<4x192xf32>
    %293 = vector.extract_strided_slice %292 {offsets = [0, 0], sizes = [2, 96], strides = [1, 1]} : vector<4x192xf32> to vector<2x96xf32>
    %294 = vector.extract_strided_slice %292 {offsets = [2, 96], sizes = [2, 96], strides = [1, 1]} : vector<4x192xf32> to vector<2x96xf32>
    %295 = tpu.concatenate %293, %294 in 0 : vector<2x96xf32>, vector<2x96xf32> -> vector<4x96xf32>
    %296 = vector.extract_strided_slice %291 {offsets = [0, 0], sizes = [4, 64], strides = [1, 1]} : vector<4x96xf32> to vector<4x64xf32>
    %297 = vector.extract_strided_slice %295 {offsets = [0, 0], sizes = [4, 64], strides = [1, 1]} : vector<4x96xf32> to vector<4x64xf32>
    %298 = arith.addf %296, %297 : vector<4x64xf32>
    %299 = arith.negf %298 : vector<4x64xf32>
    %300 = math.exp %299 : vector<4x64xf32>
    %cst_89 = arith.constant 1.000000e+00 : f32
    %301 = vector.broadcast %cst_89 : f32 to vector<4x64xf32>
    %302 = arith.addf %301, %300 : vector<4x64xf32>
    %303 = arith.divf %301, %302 : vector<4x64xf32>
    %304 = vector.extract_strided_slice %303 {offsets = [0, 0], sizes = [4, 32], strides = [1, 1]} : vector<4x64xf32> to vector<4x32xf32>
    %305 = vector.extract_strided_slice %303 {offsets = [0, 32], sizes = [4, 32], strides = [1, 1]} : vector<4x64xf32> to vector<4x32xf32>
    %306 = vector.extract_strided_slice %291 {offsets = [0, 64], sizes = [4, 32], strides = [1, 1]} : vector<4x96xf32> to vector<4x32xf32>
    %307 = vector.extract_strided_slice %295 {offsets = [0, 64], sizes = [4, 32], strides = [1, 1]} : vector<4x96xf32> to vector<4x32xf32>
    %308 = arith.addf %307, %4 : vector<4x32xf32>
    %309 = arith.mulf %304, %308 : vector<4x32xf32>
    %310 = arith.addf %306, %309 : vector<4x32xf32>
    %311 = math.tanh %310 : vector<4x32xf32>
    %cst_90 = arith.constant 1.000000e+00 : f32
    %312 = vector.broadcast %cst_90 : f32 to vector<4x32xf32>
    %313 = arith.subf %312, %305 : vector<4x32xf32>
    %314 = arith.mulf %313, %311 : vector<4x32xf32>
    %315 = arith.mulf %305, %270 : vector<4x32xf32>
    %316 = arith.addf %314, %315 : vector<4x32xf32>
    %317 = vector.extract_strided_slice %316 {offsets = [0, 0], sizes = [2, 32], strides = [1, 1]} : vector<4x32xf32> to vector<2x32xf32>
    %318 = arith.index_cast %c6_i32 : i32 to index
    %c0_91 = arith.constant 0 : index
    %c0_92 = arith.constant 0 : index
    %319 = vector.load %arg5[%318, %c0_91, %c0_92] : memref<8x2x32xf32, #tpu.memory_space<vmem>>, vector<1x2x32xf32>
    %320 = vector.shape_cast %319 : vector<1x2x32xf32> to vector<2x32xf32>
    %321 = vector.shape_cast %317 : vector<2x32xf32> to vector<1x2x32xf32>
    tpu.vector_store %arg5[%318, %c0_91, %c0_92], %321 {strides = array<i32>} : memref<8x2x32xf32, #tpu.memory_space<vmem>>, vector<1x2x32xf32>,
    %322 = vector.extract_strided_slice %316 {offsets = [2, 0], sizes = [2, 32], strides = [1, 1]} : vector<4x32xf32> to vector<2x32xf32>
    %c7_i32_93 = arith.constant 7 : i32
    %323 = arith.subi %c7_i32_93, %c6_i32 : i32
    %324 = arith.index_cast %323 : i32 to index
    %c0_94 = arith.constant 0 : index
    %c0_95 = arith.constant 0 : index
    %325 = vector.load %arg6[%324, %c0_94, %c0_95] : memref<8x2x32xf32, #tpu.memory_space<vmem>>, vector<1x2x32xf32>
    %326 = vector.shape_cast %325 : vector<1x2x32xf32> to vector<2x32xf32>
    %327 = vector.shape_cast %322 : vector<2x32xf32> to vector<1x2x32xf32>
    tpu.vector_store %arg6[%324, %c0_94, %c0_95], %327 {strides = array<i32>} : memref<8x2x32xf32, #tpu.memory_space<vmem>>, vector<1x2x32xf32>,
    %c7_i32_96 = arith.constant 7 : i32
    %328 = arith.index_cast %c7_i32_96 : i32 to index
    %c0_97 = arith.constant 0 : index
    %c0_98 = arith.constant 0 : index
    %329 = vector.load %arg1[%328, %c0_97, %c0_98] : memref<8x2x192xf32, #tpu.memory_space<vmem>>, vector<1x2x192xf32>
    %330 = vector.shape_cast %329 : vector<1x2x192xf32> to vector<2x192xf32>
    %c7_i32_99 = arith.constant 7 : i32
    %331 = arith.subi %c7_i32_99, %c7_i32_96 : i32
    %332 = arith.index_cast %331 : i32 to index
    %c0_100 = arith.constant 0 : index
    %c0_101 = arith.constant 0 : index
    %333 = vector.load %arg2[%332, %c0_100, %c0_101] : memref<8x2x192xf32, #tpu.memory_space<vmem>>, vector<1x2x192xf32>
    %334 = vector.shape_cast %333 : vector<1x2x192xf32> to vector<2x192xf32>
    %335 = vector.extract_strided_slice %330 {offsets = [0, 0], sizes = [2, 96], strides = [1, 1]} : vector<2x192xf32> to vector<2x96xf32>
    %336 = vector.extract_strided_slice %334 {offsets = [0, 96], sizes = [2, 96], strides = [1, 1]} : vector<2x192xf32> to vector<2x96xf32>
    %337 = tpu.concatenate %335, %336 in 0 : vector<2x96xf32>, vector<2x96xf32> -> vector<4x96xf32>
    %cst_102 = arith.constant dense<0.000000e+00> : vector<4x192xf32>
    %338 = tpu.matmul %316, %3, %cst_102 {dimension_numbers = #tpu.dot_dimension_numbers<[1], [0], [0], [1], [0, 0, 1, 1], [], []>} : vector<4x32xf32>, vector<32x192xf32>, vector<4x192xf32> -> vector<4x192xf32>
    %339 = vector.extract_strided_slice %338 {offsets = [0, 0], sizes = [2, 96], strides = [1, 1]} : vector<4x192xf32> to vector<2x96xf32>
    %340 = vector.extract_strided_slice %338 {offsets = [2, 96], sizes = [2, 96], strides = [1, 1]} : vector<4x192xf32> to vector<2x96xf32>
    %341 = tpu.concatenate %339, %340 in 0 : vector<2x96xf32>, vector<2x96xf32> -> vector<4x96xf32>
    %342 = vector.extract_strided_slice %337 {offsets = [0, 0], sizes = [4, 64], strides = [1, 1]} : vector<4x96xf32> to vector<4x64xf32>
    %343 = vector.extract_strided_slice %341 {offsets = [0, 0], sizes = [4, 64], strides = [1, 1]} : vector<4x96xf32> to vector<4x64xf32>
    %344 = arith.addf %342, %343 : vector<4x64xf32>
    %345 = arith.negf %344 : vector<4x64xf32>
    %346 = math.exp %345 : vector<4x64xf32>
    %cst_103 = arith.constant 1.000000e+00 : f32
    %347 = vector.broadcast %cst_103 : f32 to vector<4x64xf32>
    %348 = arith.addf %347, %346 : vector<4x64xf32>
    %349 = arith.divf %347, %348 : vector<4x64xf32>
    %350 = vector.extract_strided_slice %349 {offsets = [0, 0], sizes = [4, 32], strides = [1, 1]} : vector<4x64xf32> to vector<4x32xf32>
    %351 = vector.extract_strided_slice %349 {offsets = [0, 32], sizes = [4, 32], strides = [1, 1]} : vector<4x64xf32> to vector<4x32xf32>
    %352 = vector.extract_strided_slice %337 {offsets = [0, 64], sizes = [4, 32], strides = [1, 1]} : vector<4x96xf32> to vector<4x32xf32>
    %353 = vector.extract_strided_slice %341 {offsets = [0, 64], sizes = [4, 32], strides = [1, 1]} : vector<4x96xf32> to vector<4x32xf32>
    %354 = arith.addf %353, %4 : vector<4x32xf32>
    %355 = arith.mulf %350, %354 : vector<4x32xf32>
    %356 = arith.addf %352, %355 : vector<4x32xf32>
    %357 = math.tanh %356 : vector<4x32xf32>
    %cst_104 = arith.constant 1.000000e+00 : f32
    %358 = vector.broadcast %cst_104 : f32 to vector<4x32xf32>
    %359 = arith.subf %358, %351 : vector<4x32xf32>
    %360 = arith.mulf %359, %357 : vector<4x32xf32>
    %361 = arith.mulf %351, %316 : vector<4x32xf32>
    %362 = arith.addf %360, %361 : vector<4x32xf32>
    %363 = vector.extract_strided_slice %362 {offsets = [0, 0], sizes = [2, 32], strides = [1, 1]} : vector<4x32xf32> to vector<2x32xf32>
    %364 = arith.index_cast %c7_i32_96 : i32 to index
    %c0_105 = arith.constant 0 : index
    %c0_106 = arith.constant 0 : index
    %365 = vector.load %arg5[%364, %c0_105, %c0_106] : memref<8x2x32xf32, #tpu.memory_space<vmem>>, vector<1x2x32xf32>
    %366 = vector.shape_cast %365 : vector<1x2x32xf32> to vector<2x32xf32>
    %367 = vector.shape_cast %363 : vector<2x32xf32> to vector<1x2x32xf32>
    tpu.vector_store %arg5[%364, %c0_105, %c0_106], %367 {strides = array<i32>} : memref<8x2x32xf32, #tpu.memory_space<vmem>>, vector<1x2x32xf32>,
    %368 = vector.extract_strided_slice %362 {offsets = [2, 0], sizes = [2, 32], strides = [1, 1]} : vector<4x32xf32> to vector<2x32xf32>
    %c7_i32_107 = arith.constant 7 : i32
    %369 = arith.subi %c7_i32_107, %c7_i32_96 : i32
    %370 = arith.index_cast %369 : i32 to index
    %c0_108 = arith.constant 0 : index
    %c0_109 = arith.constant 0 : index
    %371 = vector.load %arg6[%370, %c0_108, %c0_109] : memref<8x2x32xf32, #tpu.memory_space<vmem>>, vector<1x2x32xf32>
    %372 = vector.shape_cast %371 : vector<1x2x32xf32> to vector<2x32xf32>
    %373 = vector.shape_cast %368 : vector<2x32xf32> to vector<1x2x32xf32>
    tpu.vector_store %arg6[%370, %c0_108, %c0_109], %373 {strides = array<i32>} : memref<8x2x32xf32, #tpu.memory_space<vmem>>, vector<1x2x32xf32>,
    %c8_i32 = arith.constant 8 : i32
    %c0_110 = arith.constant 0 : index
    %c0_111 = arith.constant 0 : index
    %374 = vector.load %arg7[%c0_110, %c0_111] : memref<4x32xf32, #tpu.memory_space<vmem>>, vector<4x32xf32>
    tpu.vector_store %arg7[%c0_110, %c0_111], %362 {strides = array<i32>} : memref<4x32xf32, #tpu.memory_space<vmem>>, vector<4x32xf32>,
    return
  }
  func.func @transform_0(%arg0: i32) -> (i32, i32, i32) {
    %c0_i32 = arith.constant 0 : i32
    %c0_i32_0 = arith.constant 0 : i32
    %c0_i32_1 = arith.constant 0 : i32
    return %arg0, %c0_i32, %c0_i32_0 : i32, i32, i32
  }
  func.func @transform_1(%arg0: i32) -> (i32, i32, i32) {
    %c0_i32 = arith.constant 0 : i32
    %0 = arith.subi %c0_i32, %arg0 : i32
    %c0_i32_0 = arith.constant 0 : i32
    %c0_i32_1 = arith.constant 0 : i32
    %c0_i32_2 = arith.constant 0 : i32
    return %0, %c0_i32_0, %c0_i32_1 : i32, i32, i32
  }
  func.func @transform_2(%arg0: i32) -> (i32, i32) {
    %c0_i32 = arith.constant 0 : i32
    %c0_i32_0 = arith.constant 0 : i32
    %c0_i32_1 = arith.constant 0 : i32
    return %c0_i32, %c0_i32_0 : i32, i32
  }
  func.func @transform_3(%arg0: i32) -> (i32, i32) {
    %c0_i32 = arith.constant 0 : i32
    %c0_i32_0 = arith.constant 0 : i32
    %c0_i32_1 = arith.constant 0 : i32
    return %c0_i32, %c0_i32_0 : i32, i32
  }
  func.func @transform_4(%arg0: i32) -> (i32, i32, i32) {
    %c0_i32 = arith.constant 0 : i32
    %c0_i32_0 = arith.constant 0 : i32
    %c0_i32_1 = arith.constant 0 : i32
    return %arg0, %c0_i32, %c0_i32_0 : i32, i32, i32
  }
  func.func @transform_5(%arg0: i32) -> (i32, i32, i32) {
    %c0_i32 = arith.constant 0 : i32
    %0 = arith.subi %c0_i32, %arg0 : i32
    %c0_i32_0 = arith.constant 0 : i32
    %c0_i32_1 = arith.constant 0 : i32
    %c0_i32_2 = arith.constant 0 : i32
    return %0, %c0_i32_0, %c0_i32_1 : i32, i32, i32
  }
}

</mosaic_0001>

<bundles_post_ra>
// kernel: rnn_forward.2
= control target key start
LH: loop header
LB: loop body
LE: loop exit
PB: predicated region body
PF: predicated region fallthrough
CT: control target
= control target key end

     0   :  { %vm22_vm0 = vcmask 261120   ;;  %v203_v26 = vmov 0.0   ;;  %v80_v45 = vlaneseq  ;;  %vm174_vm1 = vcmask 523264   ;;  %s291_s0 = inlined_call_operand.vmem [shape: f32[16,32], index: 0, kind: input, shape index: {}]   ;;  %s292_s3 = inlined_call_operand.vmem [shape: f32[32,192], index: 3, kind: input, shape index: {}]   ;;  %s293_s1 = inlined_call_operand.vmem [shape: f32[1,32], index: 1, kind: input, shape index: {}]   ;;  %s294_s2 = inlined_call_operand.vmem [shape: f32[1,32], index: 2, kind: input, shape index: {}]   ;;  %s295_s4 = inlined_call_operand.vmem [shape: f32[1,192], index: 4, kind: input, shape index: {}]   ;;  %s296_s5 = inlined_call_operand.vmem [shape: f32[16,192], index: 5, kind: output, shape index: {}]  }
   0x1   :  { %v20_v0 = vld [vmem:[%s291_s0] sm:$0xff]  ;;  %v21_v1 = vld [vmem:[%s291_s0 + $0x8] sm:$0xff]  ;;  %v73_v15 = vld [vmem:[%s292_s3 + $0x18] sm:$0xff]  ;;  %160 = vmatprep.mubr.f32.mxu0 %v203_v26  ;;  %166 = vmatprep.mubr.f32.mxu1 %v203_v26 }
   0x2   :  { %v23_v2 = vsel %vm22_vm0, %v20_v0, 0.0  ;;  %v26_v3 = vsel %vm22_vm0, %v21_v1, 0.0  ;;  %v71_v14 = vld [vmem:[%s292_s3 + $0x8] sm:$0xff]  ;;  %v70_v17 = vld [vmem:[%s292_s3] sm:$0xff]  ;;  %v72_v18 = vld [vmem:[%s292_s3 + $0x10] sm:$0xff]  ;;  %v81_v46 = vshrl.u32 %v80_v45, 7 }
   0x3   :  { %24 = vadd.xlane.f32.xlu0 %v23_v2  ;;  %v186_v16 = vpack.c.bf16 %v73_v15, %v71_v14  ;;  %v188_v19 = vpack.c.bf16 %v72_v18, %v70_v17  ;;  %v75_v20 = vld [vmem:[%s292_s3 + $0x28] sm:$0xff]  ;;  %v77_v21 = vld [vmem:[%s292_s3 + $0x38] sm:$0xff]  ;;  %v74_v23 = vld [vmem:[%s292_s3 + $0x20] sm:$0xff] }
   0x4   :  { %v190_v22 = vpack.c.bf16 %v77_v21, %v75_v20  ;;  %v76_v24 = vld [vmem:[%s292_s3 + $0x30] sm:$0xff]  ;;  %v182_v34 = vld [vmem:[%s293_s1] ss:$0 sm:$0xff]  ;;  %v82_v47 = vsub.s32 0, %v81_v46  ;;  %v86_v49 = vsub.s32 1, %v81_v46 }
   0x5   :  { %187 = vmatprep.subr.bf16.mxu0 %v186_v16  ;;  %194 = vmatprep.subr.bf16.mxu1 %v186_v16  ;;  %v192_v25 = vpack.c.bf16 %v76_v24, %v74_v23  ;;  %v183_v36 = vld [vmem:[%s294_s2] ss:$0 sm:$0xff] }
   0x6   :  { %189 = vmatpush1.bf16.msra.mxu0 %v188_v19  ;;  %196 = vmatpush1.bf16.msra.mxu1 %v188_v19  ;;  %v78_v48 = vld [vmem:[%s295_s4] sm:$0x3] }
   0x7   :  { %27 = vadd.xlane.f32.xlu0 %v26_v3  ;;  %191 = vmatprep.subr.bf16.mxu0 %v190_v22  ;;  %v83_v50 = vrot.slane %v78_v48, %v82_v47  ;;  %v87_v51 = vrot.slane %v78_v48, %v86_v49 }
   0x8   :  { %195 = vmatprep.subr.bf16.mxu1 %v190_v22 }
   0xa   :  { %193 = vmatpush1.bf16.msra.mxu0 %v192_v25  ;;  %197 = vmatpush1.bf16.msra.mxu1 %v192_v25 }
  0x90   :  { %v25_v4 = vpop.xlane.xlu0 %24 }
  0x91   :  { %v30_v5 = vmul.f32 0.03125, %v25_v4 }
  0x93   :  { %v32_v6 = vsub.f32 %v20_v0, %v30_v5 }
  0x94   :  { %v28_v7 = vpop.xlane.xlu0 %27 }
  0x95   :  { %v31_v8 = vmul.f32 0.03125, %v28_v7  ;;  %v34_v9 = vmul.f32 %v32_v6, %v32_v6 }
  0x97   :  { %v33_v10 = vsub.f32 %v21_v1, %v31_v8  ;;  %v36_v11 = vsel %vm22_vm0, %v34_v9, 0.0 }
  0x98   :  { %37 = vadd.xlane.f32.xlu1 %v36_v11 }
  0x99   :  { %v35_v12 = vmul.f32 %v33_v10, %v33_v10 }
  0x9b   :  { %v39_v13 = vsel %vm22_vm0, %v35_v12, 0.0 }
  0x9c   :  { %40 = vadd.xlane.f32.xlu1 %v39_v13 }
 0x125   :  { %v38_v27 = vpop.xlane.xlu1 %37 }
 0x126   :  { %v42_v28 = vmul.f32 0.03125, %v38_v27 }
 0x128   :  { %v44_v29 = vadd.f32 1e-05, %v42_v28 }
 0x129   :  { %v41_v30 = vpop.xlane.xlu1 %40 }
 0x12a   :  { %199 = vrsqrt.f32 %v44_v29  ;;  %v43_v31 = vmul.f32 0.03125, %v41_v30 }
 0x12c   :  { %v45_v32 = vadd.f32 1e-05, %v43_v31 }
 0x12e   :  { %201 = vrsqrt.f32 %v45_v32 }
 0x134   :  { %v200_v33 = vpop.eup %199 }
 0x135   :  { %v48_v35 = vmul.f32 %v200_v33, %v32_v6 }
 0x137   :  { %v57_v37 = vmul.f32 %v182_v34, %v48_v35 }
 0x138   :  { %v202_v38 = vpop.eup %201 }
 0x139   :  { %v49_v39 = vmul.f32 %v202_v38, %v33_v10  ;;  %v66_v40 = vadd.f32 %v183_v36, %v57_v37 }
 0x13b   :  { %v68_v41 = vmax.f32 %v66_v40, 0.0  ;;  %v58_v42 = vmul.f32 %v182_v34, %v49_v39 }
 0x13d   :  { %184 = vmatmul.mubr.msk.f32.vlgmr.msra.gmra.mrb[0].mxu0 %vm22_vm0, %v68_v41  ;;  %v67_v43 = vadd.f32 %v183_v36, %v58_v42 }
 0x13f   :  { %v69_v44 = vmax.f32 %v67_v43, 0.0 }
 0x141   :  { %185 = vmatmul.mubr.msk.f32.vlgmr.msra.gmra.mrb[0].mxu1 %vm22_vm0, %v69_v44 }
 0x210   :  { %v162_v52 = vpop.f32.mrb[0].mxu0 }
 0x211   :  { %v163_v53 = vadd.f32 %v162_v52, %v83_v50  ;;  %v164_v54 = vpop.f32.mrb[1].mxu0 }
 0x212   :  { %v165_v55 = vadd.f32 %v164_v54, %v87_v51 }
 0x213   :  { %173 = vst [vmem:[%s296_s5] sm:$0xff] %v163_v53 }
 0x214   :  { %175 = vst.msk [vmem:[%s296_s5 + $0x8] sm:$0xff] %vm174_vm1, %v165_v55  ;;  %v168_v56 = vpop.f32.mrb[0].mxu1 }
 0x215   :  { %v169_v57 = vadd.f32 %v168_v56, %v83_v50  ;;  %v170_v58 = vpop.f32.mrb[1].mxu1 }
 0x216   :  { %v171_v59 = vadd.f32 %v170_v58, %v87_v51 }
 0x217   :  { %176 = vst [vmem:[%s296_s5 + $0x10] sm:$0xff] %v169_v57 }
 0x218   :  { %177 = vst.msk [vmem:[%s296_s5 + $0x18] sm:$0xff] %vm174_vm1, %v171_v59 }

// kernel: rnn_forward.3
= control target key start
LH: loop header
LB: loop body
LE: loop exit
PB: predicated region body
PF: predicated region fallthrough
CT: control target
= control target key end

     0   :  { %vm62_vm0 = vcmask 257024   ;;  %v1393_v3 = vmov 0.0   ;;  %vm91_vm1 = vcmask 261120   ;;  %v1394_v14 = vmov 1983009808   ;;  %s1395_s10 = smov 64   ;;  %s1744_s2 = inlined_call_operand.vmem [shape: f32[32,192], index: 2, kind: input, shape index: {}]   ;;  %s1745_s3 = inlined_call_operand.vmem [shape: f32[4,32], index: 3, kind: input, shape index: {}]   ;;  %s1746_s1 = inlined_call_operand.vmem [shape: f32[8,2,192], index: 1, kind: input, shape index: {}, may-alias: {0,1}]   ;;  %s1747_s0 = inlined_call_operand.vmem [shape: f32[8,2,192], index: 0, kind: input, shape index: {}, may-alias: {0,1}]   ;;  %s1748_s4 = inlined_call_operand.vmem [shape: f32[8,2,32], index: 4, kind: output, shape index: {0}]   ;;  %s1749_s5 = inlined_call_operand.vmem [shape: f32[8,2,32], index: 5, kind: output, shape index: {1}]  }
   0x1   :  { %v65_v0 = vld [vmem:[%s1744_s2 + $0x8] sm:$0xff]  ;;  %v67_v1 = vld [vmem:[%s1744_s2 + $0x18] sm:$0xff]  ;;  %v64_v2 = vld [vmem:[%s1744_s2] sm:$0xff]  ;;  %163 = vmatprep.mubr.f32.mxu0 %v1393_v3  ;;  %63 = vst.msk [vmem:[#allocation2] sm:$0xf] %vm62_vm0, %v1393_v3  ;;  %309 = vmatprep.mubr.f32.mxu1 %v1393_v3  ;;  %v80_v15 = vunpack.c.l.s4 %v1394_v14  ;;  %v82_v16 = vlaneseq  ;;  %s1396_s13 = smov 32  }
   0x2   :  { %v1441_v4 = vpack.c.bf16 %v67_v1, %v65_v0  ;;  %v66_v5 = vld [vmem:[%s1744_s2 + $0x10] sm:$0xff]  ;;  %v69_v6 = vld [vmem:[%s1744_s2 + $0x28] sm:$0xff]  ;;  %v71_v7 = vld [vmem:[%s1744_s2 + $0x38] sm:$0xff]  ;;  %vm94_vm2 = vcmask 1041408   ;;  %s1397_s15 = smov 96   ;;  %vm217_vm3 = vcmask 254976  }
   0x3   :  { %v1452_v8 = vpack.c.bf16 %v66_v5, %v64_v2  ;;  %v1454_v9 = vpack.c.bf16 %v71_v7, %v69_v6  ;;  %v68_v10 = vld [vmem:[%s1744_s2 + $0x20] sm:$0xff]  ;;  %v70_v11 = vld [vmem:[%s1744_s2 + $0x30] sm:$0xff]  ;;  %v81_v17 = vunpack.c.0.s8 %v80_v15  ;;  %v83_v18 = vshrl.u32 %v82_v16, 7  ;;  %v1337_v20 = vld [vmem:[%s1746_s1 + $0x1c] ss:$0 sps:$4 sm:$0xff]  }
   0x4   :  { %1269 = vmatprep.subr.bf16.mxu0 %v1441_v4  ;;  %1277 = vmatprep.subr.bf16.mxu1 %v1441_v4  ;;  %v1465_v12 = vpack.c.bf16 %v70_v11, %v68_v10  ;;  %v72_v19 = vld [vmem:[%s1745_s3] sm:$0xf]  ;;  %vm220_vm4 = vcmask 257026   ;;  %v1338_v54 = vld [vmem:[%s1746_s1 + $0x18] ss:$0 sps:$4 sm:$0xff]  }
   0x5   :  { %1271 = vmatpush1.bf16.msra.mxu0 %v1452_v8  ;;  %1279 = vmatpush1.bf16.msra.mxu1 %v1452_v8  ;;  %v1487_v21 = vsub.s32 %v81_v17, %v83_v18  ;;  %v74_v34 = vld [vmem:[%s1747_s0] sm:$0xf]  ;;  %v1228_v2 = vld [vmem:[%s1747_s0 + $0x4] sm:$0xf] }
   0x6   :  { %1273 = vmatprep.subr.bf16.mxu0 %v1454_v9  ;;  %1281 = vmatprep.subr.bf16.mxu1 %v1454_v9 }
   0x7   :  { %187 = vrot.lane.b32.xlu1 %v72_v19, %s1395_s10  ;;  %v85_v22 = vrot.slane %v1337_v20, %v1487_v21  ;;  %v234_v55 = vrot.slane %v1338_v54, %v1487_v21 }
   0x8   :  { %v73_v13 = vld [vmem:[#allocation2] sm:$0xf] }
   0x9   :  { %1275 = vmatpush1.bf16.msra.mxu0 %v1465_v12  ;;  %1283 = vmatpush1.bf16.msra.mxu1 %v1465_v12  ;;  %v86_v25 = vcombine.high %v85_v22, %v85_v22  ;;  %v235_v58 = vcombine.high %v234_v55, %v234_v55 }
   0xa   :  { %1285 = vmatprep.subr.bf16.mxu0 %v1441_v4  ;;  %1293 = vmatprep.subr.bf16.mxu1 %v1441_v4 }
   0xb   :  { %87 = vrot.lane.b32.xlu1 %v85_v22, %s1396_s13 }
   0xc   :  { %1225 = vmatmul.mubr.msk.f32.vlgmr.msra.gmra.mrb[0].mxu0 %vm91_vm1, %v73_v13 }
   0xd   :  { %1287 = vmatpush1.bf16.msra.mxu0 %v1452_v8  ;;  %447 = vmatprep.mubr.f32.mxu0 %v1393_v3 }
   0xe   :  { %1289 = vmatprep.subr.bf16.mxu0 %v1454_v9 }
  0x11   :  { %1291 = vmatpush1.bf16.msra.mxu0 %v1465_v12 }
  0x12   :  { %1301 = vmatprep.subr.bf16.mxu0 %v1441_v4 }
  0x79   :  { %v1495_v29 = vpop.permute.xlu1 %187 }
  0x7d   :  { %v88_v32 = vpop.permute.xlu1 %87 }
  0xdf   :  { %v165_v23 = vpop.f32.mrb[0].mxu0 }
  0xe0   :  { %172 = vrot.lane.b32.xlu0 %v165_v23, %s1396_s13  ;;  %v167_v24 = vpop.f32.mrb[1].mxu0 }
  0xe4   :  { %174 = vrot.lane.b32.xlu0 %v167_v24, %s1396_s13 }
  0xe8   :  { %89 = vrot.lane.b32.xlu0 %v86_v25, %s1396_s13 }
 0x152   :  { %v173_v26 = vpop.permute.xlu0 %172 }
 0x156   :  { %v175_v27 = vpop.permute.xlu0 %174 }
 0x157   :  { %v176_v28 = vsel %vm91_vm1, %v173_v26, %v175_v27  ;;  %v1339_v27 = vld [vmem:[%s1746_s1 + $0x14] ss:$0 sps:$4 sm:$0xff]  }
 0x158   :  { %v178_v30 = vsel %vm94_vm2, %v165_v23, %v176_v28  ;;  %v372_v28 = vrot.slane %v1339_v27, %v1487_v21 }
 0x159   :  { %v190_v31 = vadd.f32 %v1495_v29, %v178_v30 }
 0x15a   :  { %v90_v33 = vpop.permute.xlu0 %89 }
 0x15b   :  { %192 = vrot.lane.b32.xlu1 %v190_v31, %s1395_s10  ;;  %v92_v35 = vsel %vm91_vm1, %v88_v32, %v90_v33  ;;  %v373_v32 = vcombine.high %v372_v28, %v372_v28 }
 0x15c   :  { %v95_v36 = vsel %vm94_vm2, %v74_v34, %v92_v35 }
 0x15d   :  { %v179_v37 = vadd.f32 %v178_v30, %v95_v36 }
 0x15f   :  { %v1226_v38 = vmul.f32 -1.442695, %v179_v37 }
 0x161   :  { %1345 = vpow2.f32 %v1226_v38 }
 0x16b   :  { %v1346_v39 = vpop.eup %1345 }
 0x16c   :  { %v183_v40 = vadd.f32 1.0, %v1346_v39 }
 0x16e   :  { %1347 = vrcp.f32 %v183_v40  ;;  %v1234_v40 = vld [vmem:[%s1747_s0 + $0x8] sm:$0xf] }
 0x178   :  { %v1348_v41 = vpop.eup %1347 }
 0x179   :  { %v202_v48 = vsub.f32 1.0, %v1348_v41 }
 0x1cd   :  { %v193_v42 = vpop.permute.xlu1 %192 }
 0x1ce   :  { %v195_v43 = vmul.f32 %v1348_v41, %v193_v42 }
 0x1d0   :  { %197 = vrot.lane.b32.xlu0 %v195_v43, %s1395_s10 }
 0x1d4   :  { %208 = vrot.lane.b32.xlu0 %v73_v13, %s1396_s13 }
 0x242   :  { %v198_v44 = vpop.permute.xlu0 %197 }
 0x243   :  { %v200_v45 = vadd.f32 %v198_v44, %v95_v36 }
 0x245   :  { %1349 = vtanh.f32 %v200_v45 }
 0x246   :  { %v209_v47 = vpop.permute.xlu0 %208 }
 0x247   :  { %v211_v50 = vmul.f32 %v1348_v41, %v209_v47 }
 0x24f   :  { %v1350_v46 = vpop.eup %1349 }
 0x250   :  { %204 = vrot.lane.b32.xlu1 %v1350_v46, %s1397_s15 }
 0x2c2   :  { %v205_v49 = vpop.permute.xlu1 %204 }
 0x2c3   :  { %v207_v51 = vmul.f32 %v205_v49, %v202_v48 }
 0x2c5   :  { %v212_v52 = vadd.f32 %v211_v50, %v207_v51 }
 0x2c7   :  { %214 = vrot.lane.b32.xlu1 %v212_v52, %s1397_s15 }
 0x339   :  { %v215_v53 = vpop.permute.xlu1 %214 }
 0x33a   :  { %218 = vst.msk [vmem:[%s1748_s4] sm:$0x3] %vm217_vm3, %v215_v53  ;;  %1230 = vmatmul.mubr.msk.f32.vlgmr.msra.gmra.mrb[0].mxu1 %vm91_vm1, %v215_v53 }
 0x33b   :  { %1227 = vst.msk [vmem:[%s1749_s5 + $0xc] sm:$0xc] %vm220_vm4, %v215_v53  ;;  %1295 = vmatpush1.bf16.msra.mxu1 %v1452_v8  ;;  %585 = vmatprep.mubr.f32.mxu1 %v1393_v3 }
 0x33c   :  { %1297 = vmatprep.subr.bf16.mxu1 %v1454_v9 }
 0x33f   :  { %1299 = vmatpush1.bf16.msra.mxu1 %v1465_v12 }
 0x340   :  { %1309 = vmatprep.subr.bf16.mxu1 %v1441_v4 }
 0x40d   :  { %v311_v56 = vpop.f32.mrb[0].mxu1 }
 0x40e   :  { %318 = vrot.lane.b32.xlu0 %v311_v56, %s1396_s13  ;;  %v313_v57 = vpop.f32.mrb[1].mxu1 }
 0x40f   :  { %320 = vrot.lane.b32.xlu1 %v313_v57, %s1396_s13 }
 0x412   :  { %236 = vrot.lane.b32.xlu0 %v234_v55, %s1396_s13 }
 0x413   :  { %238 = vrot.lane.b32.xlu1 %v235_v58, %s1396_s13 }
 0x480   :  { %v319_v59 = vpop.permute.xlu0 %318 }
 0x481   :  { %v321_v60 = vpop.permute.xlu1 %320 }
 0x482   :  { %v322_v61 = vsel %vm91_vm1, %v319_v59, %v321_v60  ;;  %v1340_v59 = vld [vmem:[%s1746_s1 + $0x10] ss:$0 sps:$4 sm:$0xff]  }
 0x483   :  { %v324_v62 = vsel %vm94_vm2, %v311_v56, %v322_v61  ;;  %v510_v60 = vrot.slane %v1340_v59, %v1487_v21 }
 0x484   :  { %v332_v63 = vadd.f32 %v324_v62, %v1495_v29  ;;  %v237_v0 = vpop.permute.xlu0 %236 }
 0x485   :  { %v239_v1 = vpop.permute.xlu1 %238 }
 0x486   :  { %334 = vrot.lane.b32.xlu0 %v332_v63, %s1395_s10  ;;  %v240_v5 = vsel %vm91_vm1, %v237_v0, %v239_v1  ;;  %v511_v63 = vcombine.high %v510_v60, %v510_v60 }
 0x487   :  { %v242_v6 = vsel %vm94_vm2, %v1228_v2, %v240_v5 }
 0x488   :  { %v325_v7 = vadd.f32 %v324_v62, %v242_v6 }
 0x48a   :  { %v1231_v10 = vmul.f32 -1.442695, %v325_v7 }
 0x48c   :  { %1351 = vpow2.f32 %v1231_v10  ;;  %v1240_v10 = vld [vmem:[%s1747_s0 + $0xc] sm:$0xf] }
 0x496   :  { %v1352_v11 = vpop.eup %1351 }
 0x497   :  { %v329_v13 = vadd.f32 1.0, %v1352_v11 }
 0x499   :  { %1353 = vrcp.f32 %v329_v13 }
 0x4a3   :  { %v1354_v14 = vpop.eup %1353 }
 0x4a4   :  { %v344_v20 = vsub.f32 1.0, %v1354_v14  ;;  %v350_v23 = vmul.f32 %v1354_v14, %v212_v52 }
 0x4f8   :  { %v335_v15 = vpop.permute.xlu0 %334 }
 0x4f9   :  { %v337_v16 = vmul.f32 %v1354_v14, %v335_v15 }
 0x4fb   :  { %339 = vrot.lane.b32.xlu1 %v337_v16, %s1395_s10 }
 0x56d   :  { %v340_v17 = vpop.permute.xlu1 %339 }
 0x56e   :  { %v342_v18 = vadd.f32 %v340_v17, %v242_v6 }
 0x570   :  { %1355 = vtanh.f32 %v342_v18 }
 0x57a   :  { %v1356_v19 = vpop.eup %1355 }
 0x57b   :  { %346 = vrot.lane.b32.xlu0 %v1356_v19, %s1397_s15 }
 0x5ed   :  { %v347_v22 = vpop.permute.xlu0 %346 }
 0x5ee   :  { %v349_v24 = vmul.f32 %v347_v22, %v344_v20 }
 0x5f0   :  { %v351_v25 = vadd.f32 %v350_v23, %v349_v24 }
 0x5f2   :  { %353 = vrot.lane.b32.xlu1 %v351_v25, %s1397_s15 }
 0x664   :  { %v354_v26 = vpop.permute.xlu1 %353 }
 0x665   :  { %1232 = vst.msk [vmem:[%s1748_s4 + $0x2] sm:$0x3] %vm217_vm3, %v354_v26  ;;  %1236 = vmatmul.mubr.msk.f32.vlgmr.msra.gmra.mrb[2].mxu0 %vm91_vm1, %v354_v26 }
 0x666   :  { %1233 = vst.msk [vmem:[%s1749_s5 + $0xa] sm:$0xc] %vm220_vm4, %v354_v26  ;;  %1303 = vmatpush1.bf16.msra.mxu0 %v1452_v8  ;;  %723 = vmatprep.mubr.f32.mxu0 %v1393_v3 }
 0x667   :  { %1305 = vmatprep.subr.bf16.mxu0 %v1454_v9 }
 0x66a   :  { %1307 = vmatpush1.bf16.msra.mxu0 %v1465_v12 }
 0x66b   :  { %1317 = vmatprep.subr.bf16.mxu0 %v1441_v4 }
 0x738   :  { %v449_v30 = vpop.f32.mrb[2].mxu0 }
 0x739   :  { %456 = vrot.lane.b32.xlu0 %v449_v30, %s1396_s13  ;;  %v451_v31 = vpop.f32.mrb[3].mxu0 }
 0x73a   :  { %458 = vrot.lane.b32.xlu1 %v451_v31, %s1396_s13 }
 0x73d   :  { %374 = vrot.lane.b32.xlu0 %v372_v28, %s1396_s13 }
 0x73e   :  { %376 = vrot.lane.b32.xlu1 %v373_v32, %s1396_s13  ;;  %v1341_v32 = vld [vmem:[%s1746_s1 + $0xc] ss:$0 sps:$4 sm:$0xff]  }
 0x7ab   :  { %v457_v33 = vpop.permute.xlu0 %456 }
 0x7ac   :  { %v459_v34 = vpop.permute.xlu1 %458 }
 0x7ad   :  { %v460_v35 = vsel %vm91_vm1, %v457_v33, %v459_v34  ;;  %v648_v33 = vrot.slane %v1341_v32, %v1487_v21  ;;  %v1343_v32 = vld [vmem:[%s1746_s1 + $0x4] ss:$0 sps:$4 sm:$0xff]  }
 0x7ae   :  { %v462_v36 = vsel %vm94_vm2, %v449_v30, %v460_v35 }
 0x7af   :  { %v470_v37 = vadd.f32 %v462_v36, %v1495_v29  ;;  %v375_v38 = vpop.permute.xlu0 %374 }
 0x7b0   :  { %v377_v39 = vpop.permute.xlu1 %376 }
 0x7b1   :  { %472 = vrot.lane.b32.xlu0 %v470_v37, %s1395_s10  ;;  %v378_v41 = vsel %vm91_vm1, %v375_v38, %v377_v39 }
 0x7b2   :  { %v380_v42 = vsel %vm94_vm2, %v1234_v40, %v378_v41 }
 0x7b3   :  { %v463_v43 = vadd.f32 %v462_v36, %v380_v42  ;;  %v649_v36 = vcombine.high %v648_v33, %v648_v33 }
 0x7b5   :  { %v1237_v44 = vmul.f32 -1.442695, %v463_v43 }
 0x7b7   :  { %1357 = vpow2.f32 %v1237_v44  ;;  %v1246_v44 = vld [vmem:[%s1747_s0 + $0x10] sm:$0xf] }
 0x7c1   :  { %v1358_v45 = vpop.eup %1357 }
 0x7c2   :  { %v467_v46 = vadd.f32 1.0, %v1358_v45 }
 0x7c4   :  { %1359 = vrcp.f32 %v467_v46 }
 0x7ce   :  { %v1360_v47 = vpop.eup %1359 }
 0x7cf   :  { %v482_v53 = vsub.f32 1.0, %v1360_v47  ;;  %v488_v55 = vmul.f32 %v1360_v47, %v351_v25 }
 0x823   :  { %v473_v48 = vpop.permute.xlu0 %472 }
 0x824   :  { %v475_v49 = vmul.f32 %v1360_v47, %v473_v48 }
 0x826   :  { %477 = vrot.lane.b32.xlu1 %v475_v49, %s1395_s10 }
 0x898   :  { %v478_v50 = vpop.permute.xlu1 %477 }
 0x899   :  { %v480_v51 = vadd.f32 %v478_v50, %v380_v42 }
 0x89b   :  { %1361 = vtanh.f32 %v480_v51 }
 0x8a5   :  { %v1362_v52 = vpop.eup %1361 }
 0x8a6   :  { %484 = vrot.lane.b32.xlu0 %v1362_v52, %s1397_s15 }
 0x918   :  { %v485_v54 = vpop.permute.xlu0 %484 }
 0x919   :  { %v487_v56 = vmul.f32 %v485_v54, %v482_v53 }
 0x91b   :  { %v489_v57 = vadd.f32 %v488_v55, %v487_v56 }
 0x91d   :  { %491 = vrot.lane.b32.xlu1 %v489_v57, %s1397_s15 }
 0x98f   :  { %v492_v58 = vpop.permute.xlu1 %491 }
 0x990   :  { %1238 = vst.msk [vmem:[%s1748_s4 + $0x4] sm:$0x3] %vm217_vm3, %v492_v58  ;;  %1242 = vmatmul.mubr.msk.f32.vlgmr.msra.gmra.mrb[2].mxu1 %vm91_vm1, %v492_v58 }
 0x991   :  { %1239 = vst.msk [vmem:[%s1749_s5 + $0x8] sm:$0xc] %vm220_vm4, %v492_v58  ;;  %1311 = vmatpush1.bf16.msra.mxu1 %v1452_v8  ;;  %861 = vmatprep.mubr.f32.mxu1 %v1393_v3 }
 0x992   :  { %1313 = vmatprep.subr.bf16.mxu1 %v1454_v9 }
 0x995   :  { %1315 = vmatpush1.bf16.msra.mxu1 %v1465_v12 }
 0x996   :  { %1325 = vmatprep.subr.bf16.mxu1 %v1441_v4 }
 0xa63   :  { %v587_v61 = vpop.f32.mrb[2].mxu1 }
 0xa64   :  { %594 = vrot.lane.b32.xlu0 %v587_v61, %s1396_s13  ;;  %v589_v62 = vpop.f32.mrb[3].mxu1 }
 0xa65   :  { %596 = vrot.lane.b32.xlu1 %v589_v62, %s1396_s13 }
 0xa68   :  { %512 = vrot.lane.b32.xlu0 %v510_v60, %s1396_s13 }
 0xa69   :  { %514 = vrot.lane.b32.xlu1 %v511_v63, %s1396_s13  ;;  %v1342_v63 = vld [vmem:[%s1746_s1 + $0x8] ss:$0 sps:$4 sm:$0xff]  }
 0xad6   :  { %v595_v0 = vpop.permute.xlu0 %594 }
 0xad7   :  { %v597_v1 = vpop.permute.xlu1 %596 }
 0xad8   :  { %v598_v4 = vsel %vm91_vm1, %v595_v0, %v597_v1  ;;  %v786_v0 = vrot.slane %v1342_v63, %v1487_v21  ;;  %v1344_v63 = vld [vmem:[%s1746_s1] ss:$0 sps:$4 sm:$0xff]  }
 0xad9   :  { %v600_v2 = vsel %vm94_vm2, %v587_v61, %v598_v4 }
 0xada   :  { %v608_v5 = vadd.f32 %v600_v2, %v1495_v29  ;;  %v513_v6 = vpop.permute.xlu0 %512 }
 0xadb   :  { %v515_v7 = vpop.permute.xlu1 %514 }
 0xadc   :  { %610 = vrot.lane.b32.xlu0 %v608_v5, %s1395_s10  ;;  %v516_v11 = vsel %vm91_vm1, %v513_v6, %v515_v7 }
 0xadd   :  { %v518_v13 = vsel %vm94_vm2, %v1240_v10, %v516_v11  ;;  %v1252_v10 = vld [vmem:[%s1747_s0 + $0x14] sm:$0xf] }
 0xade   :  { %v601_v14 = vadd.f32 %v600_v2, %v518_v13  ;;  %v787_v2 = vcombine.high %v786_v0, %v786_v0 }
 0xae0   :  { %v1243_v15 = vmul.f32 -1.442695, %v601_v14 }
 0xae2   :  { %1363 = vpow2.f32 %v1243_v15 }
 0xaec   :  { %v1364_v16 = vpop.eup %1363 }
 0xaed   :  { %v605_v17 = vadd.f32 1.0, %v1364_v16 }
 0xaef   :  { %1365 = vrcp.f32 %v605_v17 }
 0xaf9   :  { %v1366_v18 = vpop.eup %1365 }
 0xafa   :  { %v620_v25 = vsub.f32 1.0, %v1366_v18  ;;  %v626_v27 = vmul.f32 %v1366_v18, %v489_v57 }
 0xb4e   :  { %v611_v19 = vpop.permute.xlu0 %610 }
 0xb4f   :  { %v613_v20 = vmul.f32 %v1366_v18, %v611_v19 }
 0xb51   :  { %615 = vrot.lane.b32.xlu1 %v613_v20, %s1395_s10 }
 0xbc3   :  { %v616_v22 = vpop.permute.xlu1 %615 }
 0xbc4   :  { %v618_v23 = vadd.f32 %v616_v22, %v518_v13 }
 0xbc6   :  { %1367 = vtanh.f32 %v618_v23 }
 0xbd0   :  { %v1368_v24 = vpop.eup %1367 }
 0xbd1   :  { %622 = vrot.lane.b32.xlu0 %v1368_v24, %s1397_s15 }
 0xc43   :  { %v623_v26 = vpop.permute.xlu0 %622 }
 0xc44   :  { %v625_v28 = vmul.f32 %v623_v26, %v620_v25 }
 0xc46   :  { %v627_v30 = vadd.f32 %v626_v27, %v625_v28 }
 0xc48   :  { %629 = vrot.lane.b32.xlu1 %v627_v30, %s1397_s15 }
 0xcba   :  { %v630_v31 = vpop.permute.xlu1 %629 }
 0xcbb   :  { %1244 = vst.msk [vmem:[%s1748_s4 + $0x6] sm:$0x3] %vm217_vm3, %v630_v31  ;;  %1248 = vmatmul.mubr.msk.f32.vlgmr.msra.gmra.mrb[4].mxu0 %vm91_vm1, %v630_v31 }
 0xcbc   :  { %1245 = vst.msk [vmem:[%s1749_s5 + $0x6] sm:$0xc] %vm220_vm4, %v630_v31  ;;  %1319 = vmatpush1.bf16.msra.mxu0 %v1452_v8  ;;  %999 = vmatprep.mubr.f32.mxu0 %v1393_v3 }
 0xcbd   :  { %1321 = vmatprep.subr.bf16.mxu0 %v1454_v9 }
 0xcc0   :  { %1323 = vmatpush1.bf16.msra.mxu0 %v1465_v12 }
 0xd8e   :  { %v725_v34 = vpop.f32.mrb[4].mxu0 }
 0xd8f   :  { %732 = vrot.lane.b32.xlu0 %v725_v34, %s1396_s13  ;;  %v727_v35 = vpop.f32.mrb[5].mxu0 }
 0xd90   :  { %734 = vrot.lane.b32.xlu1 %v727_v35, %s1396_s13 }
 0xd93   :  { %650 = vrot.lane.b32.xlu0 %v648_v33, %s1396_s13  ;;  %v924_v33 = vrot.slane %v1343_v32, %v1487_v21 }
 0xd94   :  { %652 = vrot.lane.b32.xlu1 %v649_v36, %s1396_s13 }
 0xd95   :  { %v925_v36 = vcombine.high %v924_v33, %v924_v33 }
 0xe01   :  { %v733_v37 = vpop.permute.xlu0 %732 }
 0xe02   :  { %v735_v38 = vpop.permute.xlu1 %734 }
 0xe03   :  { %v736_v39 = vsel %vm91_vm1, %v733_v37, %v735_v38 }
 0xe04   :  { %v738_v40 = vsel %vm94_vm2, %v725_v34, %v736_v39 }
 0xe05   :  { %v746_v41 = vadd.f32 %v738_v40, %v1495_v29  ;;  %v651_v42 = vpop.permute.xlu0 %650 }
 0xe06   :  { %v653_v43 = vpop.permute.xlu1 %652 }
 0xe07   :  { %748 = vrot.lane.b32.xlu0 %v746_v41, %s1395_s10  ;;  %v654_v45 = vsel %vm91_vm1, %v651_v42, %v653_v43 }
 0xe08   :  { %v656_v46 = vsel %vm94_vm2, %v1246_v44, %v654_v45  ;;  %v1258_v44 = vld [vmem:[%s1747_s0 + $0x18] sm:$0xf] }
 0xe09   :  { %v739_v47 = vadd.f32 %v738_v40, %v656_v46 }
 0xe0b   :  { %v1249_v48 = vmul.f32 -1.442695, %v739_v47 }
 0xe0d   :  { %1369 = vpow2.f32 %v1249_v48 }
 0xe17   :  { %v1370_v49 = vpop.eup %1369 }
 0xe18   :  { %v743_v50 = vadd.f32 1.0, %v1370_v49 }
 0xe1a   :  { %1371 = vrcp.f32 %v743_v50 }
 0xe24   :  { %v1372_v51 = vpop.eup %1371 }
 0xe25   :  { %v758_v57 = vsub.f32 1.0, %v1372_v51  ;;  %v764_v59 = vmul.f32 %v1372_v51, %v627_v30 }
 0xe79   :  { %v749_v52 = vpop.permute.xlu0 %748 }
 0xe7a   :  { %v751_v53 = vmul.f32 %v1372_v51, %v749_v52 }
 0xe7c   :  { %753 = vrot.lane.b32.xlu1 %v751_v53, %s1395_s10 }
 0xeee   :  { %v754_v54 = vpop.permute.xlu1 %753 }
 0xeef   :  { %v756_v55 = vadd.f32 %v754_v54, %v656_v46 }
 0xef1   :  { %1373 = vtanh.f32 %v756_v55 }
 0xefb   :  { %v1374_v56 = vpop.eup %1373 }
 0xefc   :  { %760 = vrot.lane.b32.xlu0 %v1374_v56, %s1397_s15 }
 0xf6e   :  { %v761_v58 = vpop.permute.xlu0 %760 }
 0xf6f   :  { %v763_v60 = vmul.f32 %v761_v58, %v758_v57 }
 0xf71   :  { %v765_v61 = vadd.f32 %v764_v59, %v763_v60 }
 0xf73   :  { %767 = vrot.lane.b32.xlu1 %v765_v61, %s1397_s15 }
 0xfe5   :  { %v768_v62 = vpop.permute.xlu1 %767 }
 0xfe6   :  { %1250 = vst.msk [vmem:[%s1748_s4 + $0x8] sm:$0x3] %vm217_vm3, %v768_v62  ;;  %1254 = vmatmul.mubr.msk.f32.vlgmr.msra.gmra.mrb[4].mxu1 %vm91_vm1, %v768_v62 }
 0xfe7   :  { %1251 = vst.msk [vmem:[%s1749_s5 + $0x4] sm:$0xc] %vm220_vm4, %v768_v62  ;;  %1327 = vmatpush1.bf16.msra.mxu1 %v1452_v8  ;;  %1136 = vmatprep.mubr.f32.mxu1 %v1393_v3 }
 0xfe8   :  { %1329 = vmatprep.subr.bf16.mxu1 %v1454_v9 }
 0xfeb   :  { %1331 = vmatpush1.bf16.msra.mxu1 %v1465_v12 }
0x10b9   :  { %v863_v1 = vpop.f32.mrb[4].mxu1 }
0x10ba   :  { %870 = vrot.lane.b32.xlu0 %v863_v1, %s1396_s13  ;;  %v865_v4 = vpop.f32.mrb[5].mxu1 }
0x10bb   :  { %872 = vrot.lane.b32.xlu1 %v865_v4, %s1396_s13 }
0x10be   :  { %788 = vrot.lane.b32.xlu0 %v786_v0, %s1396_s13  ;;  %v1061_v0 = vrot.slane %v1344_v63, %v1487_v21 }
0x10bf   :  { %790 = vrot.lane.b32.xlu1 %v787_v2, %s1396_s13 }
0x10c0   :  { %v1062_v2 = vcombine.high %v1061_v0, %v1061_v0 }
0x112c   :  { %v871_v3 = vpop.permute.xlu0 %870 }
0x112d   :  { %v873_v8 = vpop.permute.xlu1 %872 }
0x112e   :  { %v874_v9 = vsel %vm91_vm1, %v871_v3, %v873_v8 }
0x112f   :  { %v876_v12 = vsel %vm94_vm2, %v863_v1, %v874_v9 }
0x1130   :  { %v884_v5 = vadd.f32 %v876_v12, %v1495_v29  ;;  %v789_v6 = vpop.permute.xlu0 %788 }
0x1131   :  { %v791_v7 = vpop.permute.xlu1 %790 }
0x1132   :  { %886 = vrot.lane.b32.xlu0 %v884_v5, %s1395_s10  ;;  %v792_v11 = vsel %vm91_vm1, %v789_v6, %v791_v7  ;;  %v1264_v7 = vld [vmem:[%s1747_s0 + $0x1c] sm:$0xf] }
0x1133   :  { %v794_v13 = vsel %vm94_vm2, %v1252_v10, %v792_v11 }
0x1134   :  { %v877_v14 = vadd.f32 %v876_v12, %v794_v13 }
0x1136   :  { %v1255_v15 = vmul.f32 -1.442695, %v877_v14 }
0x1138   :  { %1375 = vpow2.f32 %v1255_v15 }
0x1142   :  { %v1376_v16 = vpop.eup %1375 }
0x1143   :  { %v881_v17 = vadd.f32 1.0, %v1376_v16 }
0x1145   :  { %1377 = vrcp.f32 %v881_v17 }
0x114f   :  { %v1378_v18 = vpop.eup %1377 }
0x1150   :  { %v896_v25 = vsub.f32 1.0, %v1378_v18  ;;  %v902_v27 = vmul.f32 %v1378_v18, %v765_v61 }
0x11a4   :  { %v887_v19 = vpop.permute.xlu0 %886 }
0x11a5   :  { %v889_v20 = vmul.f32 %v1378_v18, %v887_v19 }
0x11a7   :  { %891 = vrot.lane.b32.xlu1 %v889_v20, %s1395_s10 }
0x1219   :  { %v892_v22 = vpop.permute.xlu1 %891 }
0x121a   :  { %v894_v23 = vadd.f32 %v892_v22, %v794_v13 }
0x121c   :  { %1379 = vtanh.f32 %v894_v23 }
0x1226   :  { %v1380_v24 = vpop.eup %1379 }
0x1227   :  { %898 = vrot.lane.b32.xlu0 %v1380_v24, %s1397_s15 }
0x1299   :  { %v899_v26 = vpop.permute.xlu0 %898 }
0x129a   :  { %v901_v28 = vmul.f32 %v899_v26, %v896_v25 }
0x129c   :  { %v903_v30 = vadd.f32 %v902_v27, %v901_v28 }
0x129e   :  { %905 = vrot.lane.b32.xlu1 %v903_v30, %s1397_s15 }
0x1310   :  { %v906_v31 = vpop.permute.xlu1 %905 }
0x1311   :  { %1256 = vst.msk [vmem:[%s1748_s4 + $0xa] sm:$0x3] %vm217_vm3, %v906_v31  ;;  %1260 = vmatmul.mubr.msk.f32.vlgmr.msra.gmra.mrb[6].mxu0 %vm91_vm1, %v906_v31 }
0x1312   :  { %1257 = vst.msk [vmem:[%s1749_s5 + $0x2] sm:$0xc] %vm220_vm4, %v906_v31 }
0x13e4   :  { %v1001_v34 = vpop.f32.mrb[6].mxu0 }
0x13e5   :  { %1008 = vrot.lane.b32.xlu0 %v1001_v34, %s1396_s13  ;;  %v1003_v35 = vpop.f32.mrb[7].mxu0 }
0x13e6   :  { %1010 = vrot.lane.b32.xlu1 %v1003_v35, %s1396_s13 }
0x13e9   :  { %926 = vrot.lane.b32.xlu0 %v924_v33, %s1396_s13 }
0x13ea   :  { %928 = vrot.lane.b32.xlu1 %v925_v36, %s1396_s13 }
0x1457   :  { %v1009_v37 = vpop.permute.xlu0 %1008 }
0x1458   :  { %v1011_v38 = vpop.permute.xlu1 %1010 }
0x1459   :  { %v1012_v39 = vsel %vm91_vm1, %v1009_v37, %v1011_v38 }
0x145a   :  { %v1014_v40 = vsel %vm94_vm2, %v1001_v34, %v1012_v39 }
0x145b   :  { %v1022_v41 = vadd.f32 %v1014_v40, %v1495_v29  ;;  %v927_v42 = vpop.permute.xlu0 %926 }
0x145c   :  { %v929_v43 = vpop.permute.xlu1 %928 }
0x145d   :  { %1024 = vrot.lane.b32.xlu0 %v1022_v41, %s1395_s10  ;;  %v930_v45 = vsel %vm91_vm1, %v927_v42, %v929_v43 }
0x145e   :  { %v932_v46 = vsel %vm94_vm2, %v1258_v44, %v930_v45 }
0x145f   :  { %v1015_v47 = vadd.f32 %v1014_v40, %v932_v46 }
0x1461   :  { %v1261_v48 = vmul.f32 -1.442695, %v1015_v47 }
0x1463   :  { %1381 = vpow2.f32 %v1261_v48 }
0x146d   :  { %v1382_v49 = vpop.eup %1381 }
0x146e   :  { %v1019_v50 = vadd.f32 1.0, %v1382_v49 }
0x1470   :  { %1383 = vrcp.f32 %v1019_v50 }
0x147a   :  { %v1384_v51 = vpop.eup %1383 }
0x147b   :  { %v1034_v57 = vsub.f32 1.0, %v1384_v51  ;;  %v1040_v59 = vmul.f32 %v1384_v51, %v903_v30 }
0x14cf   :  { %v1025_v52 = vpop.permute.xlu0 %1024 }
0x14d0   :  { %v1027_v53 = vmul.f32 %v1384_v51, %v1025_v52 }
0x14d2   :  { %1029 = vrot.lane.b32.xlu1 %v1027_v53, %s1395_s10 }
0x1544   :  { %v1030_v54 = vpop.permute.xlu1 %1029 }
0x1545   :  { %v1032_v55 = vadd.f32 %v1030_v54, %v932_v46 }
0x1547   :  { %1385 = vtanh.f32 %v1032_v55 }
0x1551   :  { %v1386_v56 = vpop.eup %1385 }
0x1552   :  { %1036 = vrot.lane.b32.xlu0 %v1386_v56, %s1397_s15 }
0x15c4   :  { %v1037_v58 = vpop.permute.xlu0 %1036 }
0x15c5   :  { %v1039_v60 = vmul.f32 %v1037_v58, %v1034_v57 }
0x15c7   :  { %v1041_v61 = vadd.f32 %v1040_v59, %v1039_v60 }
0x15c9   :  { %1043 = vrot.lane.b32.xlu1 %v1041_v61, %s1397_s15 }
0x163b   :  { %v1044_v62 = vpop.permute.xlu1 %1043 }
0x163c   :  { %1262 = vst.msk [vmem:[%s1748_s4 + $0xc] sm:$0x3] %vm217_vm3, %v1044_v62  ;;  %1265 = vmatmul.mubr.msk.f32.vlgmr.msra.gmra.mrb[6].mxu1 %vm91_vm1, %v1044_v62 }
0x163d   :  { %1263 = vst.msk [vmem:[%s1749_s5] sm:$0xc] %vm220_vm4, %v1044_v62 }
0x170f   :  { %v1138_v1 = vpop.f32.mrb[6].mxu1 }
0x1710   :  { %1145 = vrot.lane.b32.xlu0 %v1138_v1, %s1396_s13  ;;  %v1140_v4 = vpop.f32.mrb[7].mxu1 }
0x1711   :  { %1147 = vrot.lane.b32.xlu1 %v1140_v4, %s1396_s13 }
0x1714   :  { %1063 = vrot.lane.b32.xlu0 %v1061_v0, %s1396_s13 }
0x1715   :  { %1065 = vrot.lane.b32.xlu1 %v1062_v2, %s1396_s13 }
0x1782   :  { %v1146_v3 = vpop.permute.xlu0 %1145 }
0x1783   :  { %v1148_v8 = vpop.permute.xlu1 %1147 }
0x1784   :  { %v1149_v9 = vsel %vm91_vm1, %v1146_v3, %v1148_v8 }
0x1785   :  { %v1151_v12 = vsel %vm94_vm2, %v1138_v1, %v1149_v9 }
0x1786   :  { %v1159_v5 = vadd.f32 %v1151_v12, %v1495_v29  ;;  %v1064_v21 = vpop.permute.xlu0 %1063 }
0x1787   :  { %v1066_v6 = vpop.permute.xlu1 %1065 }
0x1788   :  { %1161 = vrot.lane.b32.xlu0 %v1159_v5, %s1395_s10  ;;  %v1067_v10 = vsel %vm91_vm1, %v1064_v21, %v1066_v6 }
0x1789   :  { %v1069_v11 = vsel %vm94_vm2, %v1264_v7, %v1067_v10 }
0x178a   :  { %v1152_v13 = vadd.f32 %v1151_v12, %v1069_v11 }
0x178c   :  { %v1266_v14 = vmul.f32 -1.442695, %v1152_v13 }
0x178e   :  { %1387 = vpow2.f32 %v1266_v14 }
0x1798   :  { %v1388_v15 = vpop.eup %1387 }
0x1799   :  { %v1156_v16 = vadd.f32 1.0, %v1388_v15 }
0x179b   :  { %1389 = vrcp.f32 %v1156_v16 }
0x17a5   :  { %v1390_v17 = vpop.eup %1389 }
0x17a6   :  { %v1171_v23 = vsub.f32 1.0, %v1390_v17  ;;  %v1177_v25 = vmul.f32 %v1390_v17, %v1041_v61 }
0x17fa   :  { %v1162_v29 = vpop.permute.xlu0 %1161 }
0x17fb   :  { %v1164_v18 = vmul.f32 %v1390_v17, %v1162_v29 }
0x17fd   :  { %1166 = vrot.lane.b32.xlu1 %v1164_v18, %s1395_s10 }
0x186f   :  { %v1167_v19 = vpop.permute.xlu1 %1166 }
0x1870   :  { %v1169_v20 = vadd.f32 %v1167_v19, %v1069_v11 }
0x1872   :  { %1391 = vtanh.f32 %v1169_v20 }
0x187c   :  { %v1392_v22 = vpop.eup %1391 }
0x187d   :  { %1173 = vrot.lane.b32.xlu0 %v1392_v22, %s1397_s15 }
0x18ef   :  { %v1174_v24 = vpop.permute.xlu0 %1173 }
0x18f0   :  { %v1176_v26 = vmul.f32 %v1174_v24, %v1171_v23 }
0x18f2   :  { %v1178_v27 = vadd.f32 %v1177_v25, %v1176_v26 }
0x18f4   :  { %1180 = vrot.lane.b32.xlu1 %v1178_v27, %s1397_s15 }
0x1966   :  { %v1181_v28 = vpop.permute.xlu1 %1180 }
0x1967   :  { %1267 = vst.msk [vmem:[%s1748_s4 + $0xe] sm:$0x3] %vm217_vm3, %v1181_v28 }
0x1968   :  { %1185 = vst.msk [vmem:[%s1749_s5 - $0x2] sm:$0xc] %vm220_vm4, %v1181_v28 }
0x1969   :  { %1187 = vst.msk [vmem:[#allocation2] sm:$0xf] %vm62_vm0, %v1181_v28 }

</bundles_post_ra>
